<compile_context>
chip_gen: v5e
topology: v5e:2x2
jax: 0.10.0
libtpu: 0.0.40
codegen_flags: <defaults>
</compile_context>

<pallas_src>
import functools

import jax
import jax.numpy as jnp
from jax.experimental import pallas as pl
from jax.experimental.pallas import tpu as pltpu


OUT_DIM = 8          # Time2Vec out_dim (>= 2)
LANES = 128          # TPU lane width (fast/last axis)
TILE_M = 2048        # rows of 128 lanes per grid step
                     #   in  buf: 2048*128*4B          = 1 MiB   (x2 buffers)
                     #   out buf: 8*2048*128*4B        = 8 MiB   (x2 buffers)
                     #   total ~18 MiB -> within the explicit 40 MiB VMEM limit
                     #   (v5e/v6e physical 128 MiB, v7x physical 64 MiB per TC)
VMEM_LIMIT_BYTES = 40 * 1024 * 1024


def _round_up(x, k):
    return ((x + k - 1) // k) * k


def _time2vec_kernel(w_ref, phi_ref, t_ref, o_ref):
    # w_ref, phi_ref : (1, out_dim)           SMEM  (col 0 = w0/b0, rest = W/phi)
    # t_ref          : (tile_m, 128)          VMEM  lane-dense time samples
    # o_ref          : (out_dim, tile_m, 128) VMEM  one lane-dense slab per feature
    out_dim = o_ref.shape[0]
    t = t_ref[...]                                    # (tile_m, 128) f32

    # Feature 0: linear term  w0 * t + b0  (full-width VPU, unmasked store).
    o_ref[0] = (w_ref[0, 0] * t + phi_ref[0, 0]).astype(o_ref.dtype)

    # Features 1..out_dim-1: sin(W[j-1] * t + phi[j-1]).
    # Static unroll (out_dim is small); scalar splats on VPU, sin on the EUP
    # slot, each store a full 128-lane vst.  No cross-lane concatenate needed.
    # TODO(synk): if a v7x bundle dump shows sin lowering as a VALU polynomial
    # (kernel flips VALU-bound), compute the periodic features in bf16 there.
    for j in range(1, out_dim):
        o_ref[j] = jnp.sin(w_ref[0, j] * t + phi_ref[0, j]).astype(o_ref.dtype)


@functools.partial(jax.jit, static_argnames=("out_dim", "out_dtype", "layout"))
def time2vec(t, w0, b0, W, phi, *, out_dim=OUT_DIM, out_dtype=jnp.float32,
             layout="torch"):
    """Pallas Time2Vec forward.

    layout="torch"         -> t.shape + (out_dim,)   (matches the PyTorch module;
                              pays one XLA transpose of the 8*n output)
    layout="feature_major" -> (out_dim, n) slab straight out of the kernel with
                              no transpose; a following projection should
                              contract over axis 0 via dot_general.
    """
    if out_dim < 2:
        raise ValueError("Time2Vec out_dim must be >= 2")

    orig_shape = t.shape
    t_flat = t.reshape(-1).astype(jnp.float32)
    n = t_flat.shape[0]

    # Lane-dense layout: (M, 128).  Pad only the ragged 128-tail (<=127 elems);
    # when n is already a multiple of 128 there is no pad copy at all.
    m = pl.cdiv(n, LANES)
    n_pad = m * LANES
    if n_pad != n:
        # TODO(synk): replace with a 1-D ragged-last-block BlockSpec once the
        # 1-D-in-kernel reshape path is validated, to avoid this full copy.
        t_flat = jnp.pad(t_flat, (0, n_pad - n))
    t2d = t_flat.reshape(m, LANES)

    # Fold (w0, b0) and (W, phi) into length-out_dim parameter rows for SMEM.
    w_full = jnp.concatenate(
        [jnp.reshape(w0, (1,)), jnp.reshape(W, (out_dim - 1,))]
    ).astype(jnp.float32).reshape(1, out_dim)
    phi_full = jnp.concatenate(
        [jnp.reshape(b0, (1,)), jnp.reshape(phi, (out_dim - 1,))]
    ).astype(jnp.float32).reshape(1, out_dim)

    # Tile selection: big tiles to amortize the ~0.35 us per-step overhead, but
    # always >= 2 grid steps once m > 8 so the ("parallel",) axis can shard
    # across the two TensorCores on v7x (harmless on single-TC v5e/v6e).
    if m <= 8:
        tile_m = m                                   # full-dim block, grid=(1,)
    else:
        tile_m = min(TILE_M, _round_up(pl.cdiv(m, 2), 8))
    grid = (pl.cdiv(m, tile_m),)                     # ragged last block handled by Pallas

    out_itemsize = jnp.dtype(out_dtype).itemsize
    cost = pl.CostEstimate(
        flops=2 * out_dim * n_pad,                   # mul+add per feature
        transcendentals=(out_dim - 1) * n_pad,       # one sin per periodic feature
        bytes_accessed=4 * n_pad + out_dim * n_pad * out_itemsize,
    )

    out = pl.pallas_call(
        _time2vec_kernel,
        out_shape=jax.ShapeDtypeStruct((out_dim, m, LANES), out_dtype),
        grid_spec=pltpu.PrefetchScalarGridSpec(
            num_scalar_prefetch=0,
            grid=grid,
            in_specs=[
                pl.BlockSpec((1, out_dim), lambda i: (0, 0),
                             memory_space=pltpu.MemorySpace.SMEM),   # w_full
                pl.BlockSpec((1, out_dim), lambda i: (0, 0),
                             memory_space=pltpu.MemorySpace.SMEM),   # phi_full
                pl.BlockSpec((tile_m, LANES), lambda i: (i, 0)),     # t (lane-dense)
            ],
            out_specs=pl.BlockSpec((out_dim, tile_m, LANES),
                                   lambda i: (0, i, 0)),             # lane-dense slabs
        ),
        compiler_params=pltpu.CompilerParams(
            dimension_semantics=("parallel",),
            vmem_limit_bytes=VMEM_LIMIT_BYTES),
        cost_estimate=cost,
    )(w_full, phi_full, t2d)

    if layout == "feature_major":
        # No transpose: (out_dim, M, 128) -> (out_dim, n).  Consumers should
        # contract over axis 0 (dot_general) so the torch-layout copy never
        # materializes.
        return out.reshape(out_dim, n_pad)[:, :n]

    # PyTorch layout: (out_dim, M, 128) -> (M*128, out_dim) -> t.shape + (out_dim,)
    # NOTE: this transpose re-reads/re-writes the 8*n output; use
    # layout="feature_major" in a real pipeline to avoid it.
    out = jnp.moveaxis(out, 0, -1).reshape(n_pad, out_dim)
    return out[:n].reshape(*orig_shape, out_dim)


def _reference(t, w0, b0, W, phi):
    lin = w0 * t + b0
    per = jnp.sin(t[..., None] * W + phi)
    return jnp.concatenate([lin[..., None], per], axis=-1)


if __name__ == "__main__":
    key = jax.random.PRNGKey(0)
    k_t, k_w0, k_b0, k_W, k_phi = jax.random.split(key, 5)

    # Deterministic parameter init (mirrors torch.randn shapes in __init__).
    w0 = jax.random.normal(k_w0, (1,), dtype=jnp.float32)
    b0 = jax.random.normal(k_b0, (1,), dtype=jnp.float32)
    W = jax.random.normal(k_W, (OUT_DIM - 1,), dtype=jnp.float32)
    phi = jax.random.normal(k_phi, (OUT_DIM - 1,), dtype=jnp.float32)

    # Small example: batch=2, seq=64 scalar timestamps (n = 128, no pad path).
    t = jax.random.normal(k_t, (2, 64), dtype=jnp.float32)
    out = jax.block_until_ready(time2vec(t, w0, b0, W, phi, out_dim=OUT_DIM))
    ref = _reference(t, w0[0], b0[0], W, phi)
    assert out.shape == (2, 64, OUT_DIM), out.shape
    assert jnp.allclose(out, ref, atol=1e-5, rtol=1e-5), "mismatch vs reference"

    # Ragged case: n = 210 is not a multiple of 128 (exercises the pad path).
    t2 = jax.random.normal(k_t, (3, 70), dtype=jnp.float32)
    out2 = jax.block_until_ready(time2vec(t2, w0, b0, W, phi, out_dim=OUT_DIM))
    ref2 = _reference(t2, w0[0], b0[0], W, phi)
    assert out2.shape == (3, 70, OUT_DIM), out2.shape
    assert jnp.allclose(out2, ref2, atol=1e-5, rtol=1e-5), "ragged mismatch"

    # Larger case: n = 16384 -> m = 128 -> >=2 grid steps (megacore split path).
    t3 = jax.random.normal(k_t, (16, 1024), dtype=jnp.float32)
    out3 = jax.block_until_ready(time2vec(t3, w0, b0, W, phi, out_dim=OUT_DIM))
    ref3 = _reference(t3, w0[0], b0[0], W, phi)
    assert out3.shape == (16, 1024, OUT_DIM), out3.shape
    assert jnp.allclose(out3, ref3, atol=1e-5, rtol=1e-5), "multi-tile mismatch"

    # Feature-major (transpose-free) output path used by fused consumers.
    fm = jax.block_until_ready(
        time2vec(t3, w0, b0, W, phi, out_dim=OUT_DIM, layout="feature_major"))
    assert fm.shape == (OUT_DIM, 16 * 1024), fm.shape
    fm_as_torch = fm.T.reshape(16, 1024, OUT_DIM)   # test-only relayout
    assert jnp.allclose(fm_as_torch, ref3, atol=1e-5, rtol=1e-5), "feature-major mismatch"

    print("KERNEL_OK")
</pallas_src>

<mosaic_0001>
module attributes {stable_mosaic.version = 11 : i64} {
  func.func @_time2vec_kernel(%arg0: i32, %arg1: memref<1x8xf32, #tpu.memory_space<smem>>, %arg2: memref<1x8xf32, #tpu.memory_space<smem>>, %arg3: memref<1x128xf32, #tpu.memory_space<vmem>>, %arg4: memref<8x1x128xf32, #tpu.memory_space<vmem>>) attributes {dimension_semantics = [#tpu.dimension_semantics<parallel>], iteration_bounds = array<i64: 1>, scalar_prefetch = 0 : i64, scratch_operands = 0 : i64, tpu.core_type = #tpu.core_type<tc>, window_params = [{transform_indices = @transform_0, window_bounds = array<i64: 1, 8>}, {transform_indices = @transform_1, window_bounds = array<i64: 1, 8>}, {transform_indices = @transform_2, window_bounds = array<i64: 1, 128>}, {transform_indices = @transform_3, window_bounds = array<i64: 8, 1, 128>}]} {
    %c0 = arith.constant 0 : index
    %c0_0 = arith.constant 0 : index
    %0 = vector.load %arg3[%c0, %c0_0] : memref<1x128xf32, #tpu.memory_space<vmem>>, vector<1x128xf32>
    %c0_1 = arith.constant 0 : index
    %c0_2 = arith.constant 0 : index
    %1 = memref.load %arg1[%c0_1, %c0_2] : memref<1x8xf32, #tpu.memory_space<smem>>
    %2 = vector.broadcast %1 : f32 to vector<1x128xf32>
    %3 = arith.mulf %2, %0 : vector<1x128xf32>
    %c0_3 = arith.constant 0 : index
    %c0_4 = arith.constant 0 : index
    %4 = memref.load %arg2[%c0_3, %c0_4] : memref<1x8xf32, #tpu.memory_space<smem>>
    %5 = vector.broadcast %4 : f32 to vector<1x128xf32>
    %6 = arith.addf %3, %5 : vector<1x128xf32>
    %c0_5 = arith.constant 0 : index
    %c0_6 = arith.constant 0 : index
    %c0_7 = arith.constant 0 : index
    %7 = vector.load %arg4[%c0_5, %c0_6, %c0_7] : memref<8x1x128xf32, #tpu.memory_space<vmem>>, vector<1x1x128xf32>
    %8 = vector.shape_cast %7 : vector<1x1x128xf32> to vector<1x128xf32>
    %9 = vector.shape_cast %6 : vector<1x128xf32> to vector<1x1x128xf32>
    tpu.vector_store %arg4[%c0_5, %c0_6, %c0_7], %9 {strides = array<i32>} : memref<8x1x128xf32, #tpu.memory_space<vmem>>, vector<1x1x128xf32>,
    %c0_8 = arith.constant 0 : index
    %c1 = arith.constant 1 : index
    %10 = memref.load %arg1[%c0_8, %c1] : memref<1x8xf32, #tpu.memory_space<smem>>
    %11 = vector.broadcast %10 : f32 to vector<1x128xf32>
    %12 = arith.mulf %11, %0 : vector<1x128xf32>
    %c0_9 = arith.constant 0 : index
    %c1_10 = arith.constant 1 : index
    %13 = memref.load %arg2[%c0_9, %c1_10] : memref<1x8xf32, #tpu.memory_space<smem>>
    %14 = vector.broadcast %13 : f32 to vector<1x128xf32>
    %15 = arith.addf %12, %14 : vector<1x128xf32>
    %16 = math.sin %15 : vector<1x128xf32>
    %c1_11 = arith.constant 1 : index
    %c0_12 = arith.constant 0 : index
    %c0_13 = arith.constant 0 : index
    %17 = vector.load %arg4[%c1_11, %c0_12, %c0_13] : memref<8x1x128xf32, #tpu.memory_space<vmem>>, vector<1x1x128xf32>
    %18 = vector.shape_cast %17 : vector<1x1x128xf32> to vector<1x128xf32>
    %19 = vector.shape_cast %16 : vector<1x128xf32> to vector<1x1x128xf32>
    tpu.vector_store %arg4[%c1_11, %c0_12, %c0_13], %19 {strides = array<i32>} : memref<8x1x128xf32, #tpu.memory_space<vmem>>, vector<1x1x128xf32>,
    %c0_14 = arith.constant 0 : index
    %c2 = arith.constant 2 : index
    %20 = memref.load %arg1[%c0_14, %c2] : memref<1x8xf32, #tpu.memory_space<smem>>
    %21 = vector.broadcast %20 : f32 to vector<1x128xf32>
    %22 = arith.mulf %21, %0 : vector<1x128xf32>
    %c0_15 = arith.constant 0 : index
    %c2_16 = arith.constant 2 : index
    %23 = memref.load %arg2[%c0_15, %c2_16] : memref<1x8xf32, #tpu.memory_space<smem>>
    %24 = vector.broadcast %23 : f32 to vector<1x128xf32>
    %25 = arith.addf %22, %24 : vector<1x128xf32>
    %26 = math.sin %25 : vector<1x128xf32>
    %c2_17 = arith.constant 2 : index
    %c0_18 = arith.constant 0 : index
    %c0_19 = arith.constant 0 : index
    %27 = vector.load %arg4[%c2_17, %c0_18, %c0_19] : memref<8x1x128xf32, #tpu.memory_space<vmem>>, vector<1x1x128xf32>
    %28 = vector.shape_cast %27 : vector<1x1x128xf32> to vector<1x128xf32>
    %29 = vector.shape_cast %26 : vector<1x128xf32> to vector<1x1x128xf32>
    tpu.vector_store %arg4[%c2_17, %c0_18, %c0_19], %29 {strides = array<i32>} : memref<8x1x128xf32, #tpu.memory_space<vmem>>, vector<1x1x128xf32>,
    %c0_20 = arith.constant 0 : index
    %c3 = arith.constant 3 : index
    %30 = memref.load %arg1[%c0_20, %c3] : memref<1x8xf32, #tpu.memory_space<smem>>
    %31 = vector.broadcast %30 : f32 to vector<1x128xf32>
    %32 = arith.mulf %31, %0 : vector<1x128xf32>
    %c0_21 = arith.constant 0 : index
    %c3_22 = arith.constant 3 : index
    %33 = memref.load %arg2[%c0_21, %c3_22] : memref<1x8xf32, #tpu.memory_space<smem>>
    %34 = vector.broadcast %33 : f32 to vector<1x128xf32>
    %35 = arith.addf %32, %34 : vector<1x128xf32>
    %36 = math.sin %35 : vector<1x128xf32>
    %c3_23 = arith.constant 3 : index
    %c0_24 = arith.constant 0 : index
    %c0_25 = arith.constant 0 : index
    %37 = vector.load %arg4[%c3_23, %c0_24, %c0_25] : memref<8x1x128xf32, #tpu.memory_space<vmem>>, vector<1x1x128xf32>
    %38 = vector.shape_cast %37 : vector<1x1x128xf32> to vector<1x128xf32>
    %39 = vector.shape_cast %36 : vector<1x128xf32> to vector<1x1x128xf32>
    tpu.vector_store %arg4[%c3_23, %c0_24, %c0_25], %39 {strides = array<i32>} : memref<8x1x128xf32, #tpu.memory_space<vmem>>, vector<1x1x128xf32>,
    %c0_26 = arith.constant 0 : index
    %c4 = arith.constant 4 : index
    %40 = memref.load %arg1[%c0_26, %c4] : memref<1x8xf32, #tpu.memory_space<smem>>
    %41 = vector.broadcast %40 : f32 to vector<1x128xf32>
    %42 = arith.mulf %41, %0 : vector<1x128xf32>
    %c0_27 = arith.constant 0 : index
    %c4_28 = arith.constant 4 : index
    %43 = memref.load %arg2[%c0_27, %c4_28] : memref<1x8xf32, #tpu.memory_space<smem>>
    %44 = vector.broadcast %43 : f32 to vector<1x128xf32>
    %45 = arith.addf %42, %44 : vector<1x128xf32>
    %46 = math.sin %45 : vector<1x128xf32>
    %c4_29 = arith.constant 4 : index
    %c0_30 = arith.constant 0 : index
    %c0_31 = arith.constant 0 : index
    %47 = vector.load %arg4[%c4_29, %c0_30, %c0_31] : memref<8x1x128xf32, #tpu.memory_space<vmem>>, vector<1x1x128xf32>
    %48 = vector.shape_cast %47 : vector<1x1x128xf32> to vector<1x128xf32>
    %49 = vector.shape_cast %46 : vector<1x128xf32> to vector<1x1x128xf32>
    tpu.vector_store %arg4[%c4_29, %c0_30, %c0_31], %49 {strides = array<i32>} : memref<8x1x128xf32, #tpu.memory_space<vmem>>, vector<1x1x128xf32>,
    %c0_32 = arith.constant 0 : index
    %c5 = arith.constant 5 : index
    %50 = memref.load %arg1[%c0_32, %c5] : memref<1x8xf32, #tpu.memory_space<smem>>
    %51 = vector.broadcast %50 : f32 to vector<1x128xf32>
    %52 = arith.mulf %51, %0 : vector<1x128xf32>
    %c0_33 = arith.constant 0 : index
    %c5_34 = arith.constant 5 : index
    %53 = memref.load %arg2[%c0_33, %c5_34] : memref<1x8xf32, #tpu.memory_space<smem>>
    %54 = vector.broadcast %53 : f32 to vector<1x128xf32>
    %55 = arith.addf %52, %54 : vector<1x128xf32>
    %56 = math.sin %55 : vector<1x128xf32>
    %c5_35 = arith.constant 5 : index
    %c0_36 = arith.constant 0 : index
    %c0_37 = arith.constant 0 : index
    %57 = vector.load %arg4[%c5_35, %c0_36, %c0_37] : memref<8x1x128xf32, #tpu.memory_space<vmem>>, vector<1x1x128xf32>
    %58 = vector.shape_cast %57 : vector<1x1x128xf32> to vector<1x128xf32>
    %59 = vector.shape_cast %56 : vector<1x128xf32> to vector<1x1x128xf32>
    tpu.vector_store %arg4[%c5_35, %c0_36, %c0_37], %59 {strides = array<i32>} : memref<8x1x128xf32, #tpu.memory_space<vmem>>, vector<1x1x128xf32>,
    %c0_38 = arith.constant 0 : index
    %c6 = arith.constant 6 : index
    %60 = memref.load %arg1[%c0_38, %c6] : memref<1x8xf32, #tpu.memory_space<smem>>
    %61 = vector.broadcast %60 : f32 to vector<1x128xf32>
    %62 = arith.mulf %61, %0 : vector<1x128xf32>
    %c0_39 = arith.constant 0 : index
    %c6_40 = arith.constant 6 : index
    %63 = memref.load %arg2[%c0_39, %c6_40] : memref<1x8xf32, #tpu.memory_space<smem>>
    %64 = vector.broadcast %63 : f32 to vector<1x128xf32>
    %65 = arith.addf %62, %64 : vector<1x128xf32>
    %66 = math.sin %65 : vector<1x128xf32>
    %c6_41 = arith.constant 6 : index
    %c0_42 = arith.constant 0 : index
    %c0_43 = arith.constant 0 : index
    %67 = vector.load %arg4[%c6_41, %c0_42, %c0_43] : memref<8x1x128xf32, #tpu.memory_space<vmem>>, vector<1x1x128xf32>
    %68 = vector.shape_cast %67 : vector<1x1x128xf32> to vector<1x128xf32>
    %69 = vector.shape_cast %66 : vector<1x128xf32> to vector<1x1x128xf32>
    tpu.vector_store %arg4[%c6_41, %c0_42, %c0_43], %69 {strides = array<i32>} : memref<8x1x128xf32, #tpu.memory_space<vmem>>, vector<1x1x128xf32>,
    %c0_44 = arith.constant 0 : index
    %c7 = arith.constant 7 : index
    %70 = memref.load %arg1[%c0_44, %c7] : memref<1x8xf32, #tpu.memory_space<smem>>
    %71 = vector.broadcast %70 : f32 to vector<1x128xf32>
    %72 = arith.mulf %71, %0 : vector<1x128xf32>
    %c0_45 = arith.constant 0 : index
    %c7_46 = arith.constant 7 : index
    %73 = memref.load %arg2[%c0_45, %c7_46] : memref<1x8xf32, #tpu.memory_space<smem>>
    %74 = vector.broadcast %73 : f32 to vector<1x128xf32>
    %75 = arith.addf %72, %74 : vector<1x128xf32>
    %76 = math.sin %75 : vector<1x128xf32>
    %c7_47 = arith.constant 7 : index
    %c0_48 = arith.constant 0 : index
    %c0_49 = arith.constant 0 : index
    %77 = vector.load %arg4[%c7_47, %c0_48, %c0_49] : memref<8x1x128xf32, #tpu.memory_space<vmem>>, vector<1x1x128xf32>
    %78 = vector.shape_cast %77 : vector<1x1x128xf32> to vector<1x128xf32>
    %79 = vector.shape_cast %76 : vector<1x128xf32> to vector<1x1x128xf32>
    tpu.vector_store %arg4[%c7_47, %c0_48, %c0_49], %79 {strides = array<i32>} : memref<8x1x128xf32, #tpu.memory_space<vmem>>, vector<1x1x128xf32>,
    return
  }
  func.func @transform_0(%arg0: i32) -> (i32, i32) {
    %c0_i32 = arith.constant 0 : i32
    %c0_i32_0 = arith.constant 0 : i32
    %c0_i32_1 = arith.constant 0 : i32
    return %c0_i32, %c0_i32_0 : i32, i32
  }
  func.func @transform_1(%arg0: i32) -> (i32, i32) {
    %c0_i32 = arith.constant 0 : i32
    %c0_i32_0 = arith.constant 0 : i32
    %c0_i32_1 = arith.constant 0 : i32
    return %c0_i32, %c0_i32_0 : i32, i32
  }
  func.func @transform_2(%arg0: i32) -> (i32, i32) {
    %c0_i32 = arith.constant 0 : i32
    %c0_i32_0 = arith.constant 0 : i32
    return %arg0, %c0_i32 : i32, i32
  }
  func.func @transform_3(%arg0: i32) -> (i32, i32, i32) {
    %c0_i32 = arith.constant 0 : i32
    %c0_i32_0 = arith.constant 0 : i32
    %c0_i32_1 = arith.constant 0 : i32
    return %c0_i32, %arg0, %c0_i32_0 : i32, i32, i32
  }
}

</mosaic_0001>

<bundles_post_ra>
// kernel: time2vec.1
= control target key start
LH: loop header
LB: loop body
LE: loop exit
PB: predicated region body
PF: predicated region fallthrough
CT: control target
= control target key end

     0   :  { %8 = vsyncpa [#allocation3], 0  ;;  %s2090_s0 = inlined_call_operand.vmem [shape: f32[1,8], index: 0, kind: input, shape index: {}]   ;;  %s2091_s1 = inlined_call_operand.vmem [shape: f32[1,8], index: 1, kind: input, shape index: {}]   ;;  %s2092_s2 = inlined_call_operand.vmem [shape: f32[1,128], index: 2, kind: input, shape index: {}]   ;;  %s2093_s3 = inlined_call_operand.vmem [shape: f32[8,1,128], index: 3, kind: output, shape index: {}]  }
   0x1   :  { %s15_s14 = sshll.u32 %s2090_s0, 4  ;;  %s16_s14 = int_to_ptr.vmem [resolvable:$true] %s15_s14 }
   0x2   :  { %9 = vsyncpa [#allocation5], 0  ;;  %s24_s17 = sshll.u32 %s2091_s1, 4  ;;  %s1274_s18 = smov [#allocation2]   ;;  %s25_s17 = int_to_ptr.vmem [resolvable:$true] %s24_s17 }
   0x3   :  { %18 = dma.vmem_to_smem %s16_s14, 16, %s1274_s18, [#allocation3]  }
   0x4   :  { %s1275_s19 = smov [#allocation4]  }
   0x5   :  { %27 = dma.vmem_to_smem %s25_s17, 16, %s1275_s19, [#allocation5]  }
   0x6   :  { %1270 = dma.done.wait [#allocation3], 16  }
   0x7   :  { %1271 = vsyncadd [#allocation3], 4294967280 }
   0x8   :  { %1272 = dma.done.wait [#allocation5], 16  }
   0x9   :  { %1273 = vsyncadd [#allocation5], 4294967280 }
   0xa   :  { %38 = sfence }
   0xb   :  { %s40_s20 = sld [smem:[#allocation2]]  ;;  %v1312_v0 = vld [vmem:[%s2092_s2] sm:$0x1]  ;;  %v1276_v38 = vmov 683565275  }
   0xc   :  { %s43_s21 = sld [smem:[#allocation4]]  ;;  %v1277_v40 = vmov 2475754826   ;;  %v1278_v42 = vmov 2131351028  }
   0xd   :  { %s1194_s22 = sld [smem:[#allocation2 + $0x1]]  ;;  %v1279_v44 = vmov 2102212464   ;;  %v1280_v46 = vmov 920167782  }
   0xe   :  { %s1195_s0 = sld [smem:[#allocation4 + $0x1]]  ;;  %v1281_v55 = vmov 1326507024  }
   0xf   :  { %s1200_s23 = sld [smem:[#allocation2 + $0x2]] }
  0x10   :  { %s1201_s24 = sld [smem:[#allocation4 + $0x2]] }
  0x11   :  { %v41_v1 = vstv %s40_s20  ;;  %s1206_s1 = sld [smem:[#allocation2 + $0x3]] }
  0x12   :  { %v42_v2 = vmul.f32 %v41_v1, %v1312_v0  ;;  %v44_v3 = vstv %s43_s21  ;;  %s1207_s27 = sld [smem:[#allocation4 + $0x3]] }
  0x13   :  { %v48_v4 = vstv %s1194_s22  ;;  %s1549_s30 = sld [smem:[#allocation2 + $0x4]] }
  0x14   :  { %v45_v5 = vadd.f32 %v44_v3, %v42_v2  ;;  %v49_v6 = vmul.f32 %v48_v4, %v1312_v0  ;;  %v51_v7 = vstv %s1195_s0  ;;  %s1562_s4 = sld [smem:[#allocation4 + $0x4]] }
  0x15   :  { %v211_v8 = vstv %s1200_s23  ;;  %s1573_s5 = sld [smem:[#allocation2 + $0x5]] }
  0x16   :  { %46 = vst [vmem:[%s2093_s3] sm:$0x1] %v45_v5  ;;  %v1319_v9 = vadd.f32 %v51_v7, %v49_v6  ;;  %v212_v10 = vmul.f32 %v211_v8, %v1312_v0  ;;  %v214_v11 = vstv %s1201_s24  ;;  %s1578_s6 = sld [smem:[#allocation4 + $0x5]] }
  0x17   :  { %v374_v12 = vstv %s1206_s1  ;;  %s1726_s11 = sld [smem:[#allocation2 + $0x6]] }
  0x18   :  { %v53_v13 = vand.u32 2147483647, %v1319_v9  ;;  %v56_v14 = vand.u32 2139095040, %v1319_v9  ;;  %v1324_v15 = vadd.f32 %v214_v11, %v212_v10  ;;  %v375_v16 = vmul.f32 %v374_v12, %v1312_v0  ;;  %s1754_s12 = sld [smem:[#allocation4 + $0x6]] }
  0x19   :  { %v377_v17 = vstv %s1207_s27  ;;  %s1828_s17 = sld [smem:[#allocation4 + $0x7]] }
  0x1a   :  { %v57_v18 = vshrl.u32 %v56_v14, 23  ;;  %v60_v19 = vand.u32 8388607, %v53_v13  ;;  %v219_v20 = vand.u32 2139095040, %v1324_v15  ;;  %v216_v21 = vand.u32 2147483647, %v1324_v15 }
  0x1b   :  { %v1331_v22 = vadd.f32 %v377_v17, %v375_v16 }
  0x1c   :  { %v1196_v23 = vadd.s32 4294967169, %v57_v18  ;;  %v220_v24 = vshrl.u32 %v219_v20, 23  ;;  %v61_v25 = vor.u32 8388608, %v60_v19  ;;  %v223_v28 = vand.u32 8388607, %v216_v21 }
  0x1d   :  { %v382_v29 = vand.u32 2139095040, %v1331_v22 }
  0x1e   :  { %v63_v26 = vadd.s32 1, %v1196_v23  ;;  %v1202_v27 = vadd.s32 4294967169, %v220_v24  ;;  %v1336_v32 = vshll.u32 %v61_v25, 8  ;;  %v224_v35 = vor.u32 8388608, %v223_v28 }
  0x1f   :  { %v1338_v36 = vshrl.u32 %v382_v29, 23 }
  0x20   :  { %vm64_vm0 = vcmp.gt.s32.totalorder %v63_v26, 0  ;;  %v226_v30 = vadd.s32 1, %v1202_v27  ;;  %v102_v48 = vand.u32 65535, %v1336_v32  ;;  %v103_v11 = vshrl.u32 %v1336_v32, 16 }
  0x21   :  { %v65_v31 = vsel %vm64_vm0, %v63_v26, 0  ;;  %v1359_v12 = vshll.u32 %v224_v35, 8 }
  0x22   :  { %v67_v33 = vand.u32 31, %v65_v31  ;;  %vm227_vm1 = vcmp.gt.s32.totalorder %v226_v30, 0  ;;  %v66_v34 = vshrl.u32 %v65_v31, 5 }
  0x23   :  { %v228_v49 = vsel %vm227_vm1, %v226_v30, 0 }
  0x24   :  { %v68_v37 = vsub.s32 32, %v67_v33  ;;  %v70_v39 = vshll.u32 %v1276_v38, %v67_v33  ;;  %v73_v41 = vshll.u32 %v1277_v40, %v67_v33  ;;  %v76_v43 = vshll.u32 %v1278_v42, %v67_v33 }
  0x25   :  { %v79_v45 = vshll.u32 %v1279_v44, %v67_v33  ;;  %v82_v47 = vshll.u32 %v1280_v46, %v67_v33  ;;  %vm85_vm2 = vcmp.lt.s32.totalorder %v66_v34, 1  ;;  %vm86_vm3 = vcmp.lt.s32.totalorder %v66_v34, 2 }
  0x26   :  { %v69_v50 = vshrl.u32 %v1276_v38, %v68_v37  ;;  %v71_v51 = vshrl.u32 %v1277_v40, %v68_v37  ;;  %v74_v52 = vshrl.u32 %v1278_v42, %v68_v37  ;;  %v77_v53 = vshrl.u32 %v1279_v44, %v68_v37 }
  0x27   :  { %v80_v54 = vshrl.u32 %v1280_v46, %v68_v37  ;;  %v83_v56 = vshrl.u32 %v1281_v55, %v68_v37  ;;  %vm88_vm4 = vcmp.lt.s32.totalorder %v66_v34, 4  ;;  %vm87_vm5 = vcmp.lt.s32.totalorder %v66_v34, 3 }
  0x28   :  { %v72_v57 = vor.u32 %v71_v51, %v70_v39  ;;  %v75_v58 = vor.u32 %v74_v52, %v73_v41  ;;  %v78_v59 = vor.u32 %v77_v53, %v76_v43  ;;  %v1353_v62 = vand.u32 31, %v228_v49 }
  0x29   :  { %v81_v60 = vor.u32 %v80_v54, %v79_v45  ;;  %v84_v61 = vor.u32 %v83_v56, %v82_v47  ;;  %v1366_v18 = vshrl.u32 %v228_v49, 5 }
  0x2a   :  { %v89_v63 = vsel %vm85_vm2, %v69_v50, %v72_v57  ;;  %v90_v1 = vsel %vm88_vm4, %v78_v59, 2102212464  ;;  %v93_v2 = vsel %vm85_vm2, %v72_v57, %v75_v58  ;;  %v97_v3 = vsel %vm85_vm2, %v75_v58, %v78_v59 }
  0x2b   :  { %v91_v4 = vsel %vm87_vm5, %v75_v58, %v90_v1  ;;  %v94_v5 = vsel %vm88_vm4, %v81_v60, 920167782  ;;  %v98_v6 = vsel %vm88_vm4, %v84_v61, 1326507024  ;;  %v1356_v7 = vsub.s32 32, %v1353_v62 }
  0x2c   :  { %v95_v8 = vsel %vm87_vm5, %v78_v59, %v94_v5  ;;  %v99_v10 = vsel %vm87_vm5, %v81_v60, %v98_v6  ;;  %v1362_v14 = vsel %vm86_vm3, %v89_v63, %v91_v4  ;;  %v233_v25 = vshll.u32 %v1276_v38, %v1353_v62 }
  0x2d   :  { %v96_v16 = vsel %vm86_vm3, %v93_v2, %v95_v8  ;;  %v100_v17 = vsel %vm86_vm3, %v97_v3, %v99_v10  ;;  %v234_v26 = vshrl.u32 %v1277_v40, %v1356_v7  ;;  %v236_v27 = vshll.u32 %v1277_v40, %v1353_v62 }
  0x2e   :  { %v104_v19 = vand.u32 65535, %v100_v17  ;;  %v105_v20 = vshrl.u32 %v100_v17, 16  ;;  %v126_v23 = vand.u32 65535, %v96_v16  ;;  %v127_v24 = vshrl.u32 %v96_v16, 16 }
  0x2f   :  { %v237_v28 = vshrl.u32 %v1278_v42, %v1356_v7  ;;  %v239_v33 = vshll.u32 %v1278_v42, %v1353_v62  ;;  %v1378_v56 = vor.u32 %v234_v26, %v233_v25  ;;  %v1282_v57 = vmov 0  }
  0x30   :  { %v106_v29 = vmul.u32 %v104_v19, %v102_v48  ;;  %v107_v30 = vmul.u32 %v105_v20, %v102_v48  ;;  %v108_v31 = vmul.u32 %v104_v19, %v103_v11  ;;  %v109_v34 = vmul.u32 %v105_v20, %v103_v11 }
  0x31   :  { %v128_v35 = vmul.u32 %v126_v23, %v102_v48  ;;  %v129_v37 = vmul.u32 %v127_v24, %v102_v48  ;;  %v130_v39 = vmul.u32 %v126_v23, %v103_v11  ;;  %v131_v47 = vmul.u32 %v127_v24, %v103_v11 }
  0x32   :  { %v110_v41 = vshll.u32 %v107_v30, 16  ;;  %v111_v43 = vshrl.u32 %v107_v30, 16  ;;  %v112_v45 = vshll.u32 %v108_v31, 16  ;;  %v113_v49 = vshrl.u32 %v108_v31, 16 }
  0x33   :  { %v132_v50 = vshll.u32 %v129_v37, 16  ;;  %v133_v51 = vshrl.u32 %v129_v37, 16  ;;  %v134_v52 = vshll.u32 %v130_v39, 16  ;;  %v135_v54 = vshrl.u32 %v130_v39, 16 }
  0x34   :  { %vm114_vm6 = vc.u32 %v106_v29, %v110_v41  ;;  %v116_v53 = vadd.s32 %v110_v41, %v106_v29  ;;  %v240_v48 = vshrl.u32 %v1279_v44, %v1356_v7  ;;  %v242_v63 = vshll.u32 %v1279_v44, %v1353_v62 }
  0x35   :  { %v115_v58 = vsel %vm114_vm6, 1, %v1282_v57  ;;  %vm136_vm7 = vc.u32 %v128_v35, %v132_v50  ;;  %v138_v59 = vadd.s32 %v132_v50, %v128_v35  ;;  %v238_v3 = vor.u32 %v237_v28, %v236_v27 }
  0x36   :  { %v117_v60 = vadd.s32 %v115_v58, %v109_v34  ;;  %vm118_vm8 = vc.u32 %v116_v53, %v112_v45  ;;  %v137_v61 = vsel %vm136_vm7, 1, %v1282_v57  ;;  %v241_v6 = vor.u32 %v240_v48, %v239_v33 }
  0x37   :  { %v119_v1 = vsel %vm118_vm8, 1, %v1282_v57  ;;  %v139_v2 = vadd.s32 %v137_v61, %v131_v47  ;;  %vm140_vm9 = vc.u32 %v138_v59, %v134_v52  ;;  %v243_v8 = vshrl.u32 %v1280_v46, %v1356_v7 }
  0x38   :  { %v121_v4 = vadd.s32 %v119_v1, %v117_v60  ;;  %v141_v5 = vsel %vm140_vm9, 1, %v1282_v57  ;;  %v245_v11 = vshll.u32 %v1280_v46, %v1353_v62  ;;  %v246_v16 = vshrl.u32 %v1281_v55, %v1356_v7 }
  0x39   :  { %v143_v10 = vadd.s32 %v141_v5, %v139_v2  ;;  %vm248_vm10 = vcmp.lt.s32.totalorder %v1366_v18, 1  ;;  %v1395_v19 = vadd.s32 %v138_v59, %v134_v52  ;;  %v244_v20 = vor.u32 %v243_v8, %v242_v63 }
  0x3a   :  { %v122_v17 = vadd.s32 %v121_v4, %v111_v43  ;;  %vm250_vm11 = vcmp.lt.s32.totalorder %v1366_v18, 3  ;;  %v247_v24 = vor.u32 %v246_v16, %v245_v11  ;;  %vm249_vm12 = vcmp.lt.s32.totalorder %v1366_v18, 2 }
  0x3b   :  { %v144_v23 = vadd.s32 %v143_v10, %v133_v51  ;;  %vm251_vm13 = vcmp.lt.s32.totalorder %v1366_v18, 4  ;;  %v256_v62 = vsel %vm248_vm10, %v1378_v56, %v238_v3  ;;  %v1208_v27 = vadd.s32 4294967169, %v1338_v36 }
  0x3c   :  { %v1400_v25 = vadd.s32 %v122_v17, %v113_v49  ;;  %v257_v26 = vsel %vm251_vm13, %v244_v20, 920167782  ;;  %v265_v30 = vand.u32 65535, %v1359_v12  ;;  %v266_v31 = vshrl.u32 %v1359_v12, 16 }
  0x3d   :  { %v145_v28 = vadd.s32 %v144_v23, %v135_v54  ;;  %v258_v29 = vsel %vm250_vm11, %v241_v6, %v257_v26  ;;  %v146_v33 = vmul.u32 %v1336_v32, %v1362_v14  ;;  %v260_v36 = vsel %vm248_vm10, %v238_v3, %v241_v6 }
  0x3e   :  { %vm148_vm14 = vc.u32 %v1400_v25, %v1395_v19  ;;  %v259_v34 = vsel %vm249_vm12, %v256_v62, %v258_v29  ;;  %v261_v37 = vsel %vm251_vm13, %v247_v24, 1326507024  ;;  %v389_v45 = vadd.s32 1, %v1208_v27 }
  0x3f   :  { %v149_v35 = vadd.s32 1, %v145_v28  ;;  %v289_v39 = vand.u32 65535, %v259_v34  ;;  %v290_v41 = vshrl.u32 %v259_v34, 16  ;;  %v262_v43 = vsel %vm250_vm11, %v244_v20, %v261_v37 }
  0x40   :  { %v232_v14 = vshrl.u32 %v1276_v38, %v1356_v7  ;;  %v263_v47 = vsel %vm249_vm12, %v260_v36, %v262_v43  ;;  %v253_v53 = vsel %vm251_vm13, %v241_v6, 2102212464  ;;  %v379_v2 = vand.u32 2147483647, %v1331_v22 }
  0x41   :  { %v150_v32 = vsel %vm148_vm14, %v149_v35, %v145_v28  ;;  %v292_v49 = vmul.u32 %v290_v41, %v265_v30  ;;  %v267_v51 = vand.u32 65535, %v263_v47  ;;  %v268_v52 = vshrl.u32 %v263_v47, 16 }
  0x42   :  { %v151_v50 = vadd.s32 %v150_v32, %v146_v33  ;;  %v291_v54 = vmul.u32 %v289_v39, %v265_v30  ;;  %v293_v58 = vmul.u32 %v289_v39, %v266_v31  ;;  %v252_v7 = vsel %vm248_vm10, %v232_v14, %v1378_v56 }
  0x43   :  { %v295_v59 = vshll.u32 %v292_v49, 16  ;;  %v269_v60 = vmul.u32 %v267_v51, %v265_v30  ;;  %v270_v61 = vmul.u32 %v268_v52, %v265_v30  ;;  %v271_v63 = vmul.u32 %v267_v51, %v266_v31 }
  0x44   :  { %v152_v48 = vadd.s32 536870912, %v151_v50  ;;  %v297_v1 = vshll.u32 %v293_v58, 16  ;;  %vm390_vm15 = vcmp.gt.s32.totalorder %v389_v45, 0  ;;  %v272_v5 = vmul.u32 %v268_v52, %v266_v31 }
  0x45   :  { %v273_v8 = vshll.u32 %v270_v61, 16  ;;  %v275_v6 = vshll.u32 %v271_v63, 16  ;;  %v254_v10 = vsel %vm250_vm11, %v238_v3, %v253_v53  ;;  %v294_v11 = vmul.u32 %v290_v41, %v266_v31 }
  0x46   :  { %v1434_v4 = vshrl.u32 %v152_v48, 30  ;;  %vm299_vm0 = vc.u32 %v291_v54, %v295_v59  ;;  %v301_v16 = vadd.s32 %v295_v59, %v291_v54  ;;  %v391_v56 = vsel %vm390_vm15, %v389_v45, 0 }
  0x47   :  { %vm277_vm1 = vc.u32 %v269_v60, %v273_v8  ;;  %v279_v20 = vadd.s32 %v273_v8, %v269_v60  ;;  %v296_v24 = vshrl.u32 %v292_v49, 16  ;;  %v300_v62 = vsel %vm299_vm0, 1, %v1282_v57 }
  0x48   :  { %v154_v17 = vshll.u32 %v1434_v4, 30  ;;  %v278_v23 = vsel %vm277_vm1, 1, %v1282_v57  ;;  %vm303_vm2 = vc.u32 %v301_v16, %v297_v1  ;;  %v274_v27 = vshrl.u32 %v270_v61, 16 }
  0x49   :  { %v280_v28 = vadd.s32 %v278_v23, %v272_v5  ;;  %vm281_vm3 = vc.u32 %v279_v20, %v275_v6  ;;  %v276_v29 = vshrl.u32 %v271_v63, 16  ;;  %v302_v30 = vadd.s32 %v300_v62, %v294_v11 }
  0x4a   :  { %v155_v26 = vsub.s32 %v151_v50, %v154_v17  ;;  %v282_v3 = vsel %vm281_vm3, 1, %v1282_v57  ;;  %v304_v31 = vsel %vm303_vm2, 1, %v1282_v57  ;;  %v393_v36 = vand.u32 31, %v391_v56 }
  0x4b   :  { %v284_v34 = vadd.s32 %v282_v3, %v280_v28  ;;  %v255_v35 = vsel %vm249_vm12, %v252_v7, %v254_v10  ;;  %v298_v37 = vshrl.u32 %v293_v58, 16  ;;  %v306_v39 = vadd.s32 %v304_v31, %v302_v30 }
  0x4c   :  { %vm156_vm4 = vcmp.lt.s32.totalorder %v155_v26, 0  ;;  %v157_v33 = vsub.s32 0, %v155_v26  ;;  %v1445_v45 = vadd.s32 %v301_v16, %v297_v1  ;;  %vm55_vm5 = vcmp.lt.s32.totalorder %v1319_v9, 0 }
  0x4d   :  { %v285_v43 = vadd.s32 %v284_v34, %v274_v27  ;;  %v307_v14 = vadd.s32 %v306_v39, %v296_v24  ;;  %v394_v47 = vsub.s32 32, %v393_v36  ;;  %v147_v49 = vadd.s32 %v1395_v19, %v1400_v25 }
  0x4e   :  { %v158_v41 = vsel %vm156_vm4, %v157_v33, %v155_v26  ;;  %v309_v51 = vmul.u32 %v1359_v12, %v255_v35  ;;  %v386_v18 = vand.u32 8388607, %v379_v2  ;;  %v177_v53 = vsub.s32 4, %v1434_v4 }
  0x4f   :  { %v159_v32 = vclz %v158_v41  ;;  %v1450_v50 = vadd.s32 %v285_v43, %v276_v29  ;;  %v308_v54 = vadd.s32 %v307_v14, %v298_v37  ;;  %v1456_v58 = vshrl.u32 %v391_v56, 5 }
  0x50   :  { %v396_v59 = vshll.u32 %v1276_v38, %v393_v36  ;;  %v399_v19 = vshll.u32 %v1277_v40, %v393_v36  ;;  %v402_v25 = vshll.u32 %v1278_v42, %v393_v36  ;;  %v397_v48 = vshrl.u32 %v1277_v40, %v394_v47 }
  0x51   :  { %v1197_v52 = vadd.s32 4294967294, %v159_v32  ;;  %vm311_vm6 = vc.u32 %v1450_v50, %v1445_v45  ;;  %v312_v12 = vadd.s32 1, %v308_v54  ;;  %v405_v60 = vshll.u32 %v1279_v44, %v393_v36 }
  0x52   :  { %v400_v63 = vshrl.u32 %v1278_v42, %v394_v47  ;;  %v403_v7 = vshrl.u32 %v1279_v44, %v394_v47  ;;  %v406_v1 = vshrl.u32 %v1280_v46, %v394_v47  ;;  %vm1470_vm8 = vcmp.le.f32.partialorder %v53_v13, 0.7853982 }
  0x53   :  { %vm1198_vm7 = vcmp.lt.s32.totalorder %v1197_v52, 0  ;;  %v313_v10 = vsel %vm311_vm6, %v312_v12, %v308_v54  ;;  %v178_v16 = vsel %vm55_vm5, %v177_v53, %v1434_v4  ;;  %v387_v20 = vor.u32 8388608, %v386_v18 }
  0x54   :  { %v162_v61 = vsel %vm1198_vm7, 0, %v1197_v52  ;;  %v314_v17 = vadd.s32 %v313_v10, %v309_v51  ;;  %v398_v24 = vor.u32 %v397_v48, %v396_v59  ;;  %v407_v62 = vor.u32 %v406_v1, %v405_v60 }
  0x55   :  { %v163_v5 = vsub.s32 32, %v162_v61  ;;  %v164_v8 = vshll.u32 %v155_v26, %v162_v61  ;;  %v167_v6 = vsub.s32 4294967266, %v162_v61  ;;  %v401_v26 = vor.u32 %v400_v63, %v399_v19 }
  0x56   :  { %v315_v27 = vadd.s32 536870912, %v314_v17  ;;  %v408_v28 = vshll.u32 %v1280_v46, %v393_v36  ;;  %v409_v29 = vshrl.u32 %v1281_v55, %v394_v47  ;;  %v404_v30 = vor.u32 %v403_v7, %v402_v25 }
  0x57   :  { %v165_v56 = vshrl.u32 %v147_v49, %v163_v5  ;;  %v168_v23 = vadd.s32 127, %v167_v6  ;;  %vm414_vm9 = vcmp.lt.s32.totalorder %v1456_v58, 4  ;;  %vm411_vm10 = vcmp.lt.s32.totalorder %v1456_v58, 1 }
  0x58   :  { %v1480_v31 = vshrl.u32 %v315_v27, 30  ;;  %v410_v4 = vor.u32 %v409_v29, %v408_v28  ;;  %v1483_v33 = vshll.u32 %v387_v20, 8  ;;  %vm413_vm11 = vcmp.lt.s32.totalorder %v1456_v58, 3 }
  0x59   :  { %v166_v13 = vor.u32 %v165_v56, %v164_v8  ;;  %v169_v3 = vshll.u32 %v168_v23, 23  ;;  %v420_v36 = vsel %vm414_vm9, %v407_v62, 920167782  ;;  %v180_v37 = vsel %vm1470_vm8, 0, %v178_v16 }
  0x5a   :  { %v317_v39 = vshll.u32 %v1480_v31, 30  ;;  %v395_v41 = vshrl.u32 %v1276_v38, %v394_v47  ;;  %vm412_vm12 = vcmp.lt.s32.totalorder %v1456_v58, 2  ;;  %v419_v32 = vsel %vm411_vm10, %v398_v24, %v401_v26 }
  0x5b   :  { %v170_v34 = vor.u32 4788187, %v169_v3  ;;  %v173_v35 = vcvt.s32.f32 %v166_v13  ;;  %v423_v14 = vsel %vm411_vm10, %v401_v26, %v404_v30  ;;  %v424_v49 = vsel %vm414_vm9, %v410_v4, 1326507024 }
  0x5c   :  { %v1499_v51 = vsub.s32 %v314_v17, %v317_v39  ;;  %v421_v18 = vsel %vm413_vm11, %v404_v30, %v420_v36  ;;  %v425_v47 = vsel %vm413_vm11, %v407_v62, %v424_v49  ;;  %v428_v52 = vand.u32 65535, %v1483_v33 }
  0x5d   :  { %v171_v43 = vand.u32 2147483647, %v170_v34  ;;  %v416_v54 = vsel %vm414_vm9, %v404_v30, 2102212464  ;;  %v426_v59 = vsel %vm412_vm12, %v423_v14, %v425_v47  ;;  %v1511_v19 = vshrl.u32 %v1483_v33, 16 }
  0x5e   :  { %vm319_vm13 = vcmp.lt.s32.totalorder %v1499_v51, 0  ;;  %v320_v25 = vsub.s32 0, %v1499_v51  ;;  %v430_v12 = vand.u32 65535, %v426_v59  ;;  %v431_v48 = vshrl.u32 %v426_v59, 16 }
  0x5f   :  { %v174_v53 = vmul.f32 %v173_v35, %v171_v43  ;;  %v197_v61 = vadd.s32 3, %v180_v37  ;;  %v310_v63 = vadd.s32 %v1445_v45, %v1450_v50  ;;  %v422_v7 = vsel %vm412_vm12, %v419_v32, %v421_v18 }
  0x60   :  { %v321_v1 = vsel %vm319_vm13, %v320_v25, %v1499_v51  ;;  %v432_v5 = vmul.u32 %v430_v12, %v428_v52  ;;  %v433_v8 = vmul.u32 %v431_v48, %v428_v52  ;;  %v1521_v6 = vmul.u32 %v430_v12, %v1511_v19 }
  0x61   :  { %v175_v60 = vxor.u32 2147483648, %v174_v53  ;;  %vm218_vm14 = vcmp.lt.s32.totalorder %v1324_v15, 0  ;;  %v322_v16 = vclz %v321_v1  ;;  %v415_v17 = vsel %vm411_vm10, %v395_v41, %v398_v24 }
  0x62   :  { %v417_v45 = vsel %vm413_vm11, %v401_v26, %v416_v54  ;;  %v436_v20 = vshll.u32 %v433_v8, 16  ;;  %v438_v56 = vshll.u32 %v1521_v6, 16  ;;  %v453_v23 = vshrl.u32 %v422_v7, 16 }
  0x63   :  { %v176_v10 = vsel %vm55_vm5, %v175_v60, %v174_v53  ;;  %v1538_v27 = vand.u32 3, %v197_v61  ;;  %v1203_v28 = vadd.s32 4294967294, %v322_v16  ;;  %v340_v24 = vsub.s32 4, %v1480_v31 }
  0x64   :  { %v1533_v50 = vsel %vm1470_vm8, %v1319_v9, %v176_v10  ;;  %v435_v29 = vmul.u32 %v431_v48, %v1511_v19  ;;  %vm440_vm15 = vc.u32 %v432_v5, %v436_v20  ;;  %v442_v26 = vadd.s32 %v436_v20, %v432_v5 }
  0x65   :  { %v181_v62 = vmul.f32 %v1533_v50, %v1533_v50  ;;  %v452_v13 = vand.u32 65535, %v422_v7  ;;  %vm1204_vm0 = vcmp.lt.s32.totalorder %v1203_v28, 0  ;;  %v1544_v30 = vsel %vm412_vm12, %v415_v17, %v417_v45 }
  0x66   :  { %v325_v4 = vsel %vm1204_vm0, 0, %v1203_v28  ;;  %v441_v34 = vsel %vm440_vm15, 1, %v1282_v57  ;;  %vm444_vm1 = vc.u32 %v442_v26, %v438_v56  ;;  %v1547_v35 = vmul.u32 %v453_v23, %v428_v52 }
  0x67   :  { %v182_v11 = vmul.f32 -0.001358992, %v181_v62  ;;  %v189_v3 = vmul.f32 -0.00019511016, %v181_v62  ;;  %v326_v39 = vsub.s32 32, %v325_v4  ;;  %v327_v41 = vshll.u32 %v1499_v51, %v325_v4 }
  0x68   :  { %vm203_vm2 = vcmp.eq.s32.totalorder %v1538_v27, 2  ;;  %v330_v43 = vsub.s32 4294967266, %v325_v4  ;;  %v443_v32 = vadd.s32 %v441_v34, %v435_v29  ;;  %v445_v58 = vsel %vm444_vm1, 1, %v1282_v57 }
  0x69   :  { %v183_v36 = vadd.f32 0.041655596, %v182_v11  ;;  %v190_v37 = vadd.f32 0.008332121, %v189_v3  ;;  %v456_v14 = vmul.u32 %v452_v13, %v1511_v19  ;;  %v328_v47 = vshrl.u32 %v310_v63, %v326_v39 }
  0x6a   :  { %v437_v53 = vshrl.u32 %v433_v8, 16  ;;  %vm200_vm3 = vcmp.eq.s32.totalorder %v1538_v27, 0  ;;  %v331_v54 = vadd.s32 127, %v330_v43  ;;  %v1559_v59 = vsel %vm218_vm14, %v340_v24, %v1480_v31 }
  0x6b   :  { %v184_v49 = vmul.f32 %v183_v36, %v181_v62  ;;  %v191_v18 = vmul.f32 %v190_v37, %v181_v62  ;;  %v454_v51 = vmul.u32 %v452_v13, %v428_v52  ;;  %v458_v25 = vshll.u32 %v1547_v35, 16 }
  0x6c   :  { %v329_v60 = vor.u32 %v328_v47, %v327_v41  ;;  %v447_v61 = vadd.s32 %v445_v58, %v443_v32  ;;  %vm196_vm4 = vweird.f32 %v1319_v9  ;;  %vm1567_vm5 = vcmp.le.f32.partialorder %v216_v21, 0.7853982 }
  0x6d   :  { %v185_v12 = vadd.f32 -0.4999988, %v184_v49  ;;  %v192_v48 = vadd.f32 -0.16666654, %v191_v18  ;;  %v332_v31 = vshll.u32 %v331_v54, 23  ;;  %v439_v52 = vshrl.u32 %v1521_v6, 16 }
  0x6e   :  { %v457_v7 = vmul.u32 %v453_v23, %v1511_v19  ;;  %v460_v1 = vshll.u32 %v456_v14, 16  ;;  %v336_v10 = vcvt.s32.f32 %v329_v60  ;;  %v448_v16 = vadd.s32 %v447_v61, %v437_v53 }
  0x6f   :  { %v186_v5 = vmul.f32 %v185_v12, %v181_v62  ;;  %v193_v8 = vmul.f32 %v192_v48, %v181_v62  ;;  %v333_v17 = vor.u32 4788187, %v332_v31  ;;  %vm462_vm6 = vc.u32 %v454_v51, %v458_v25 }
  0x70   :  { %v464_v45 = vadd.s32 %v458_v25, %v454_v51  ;;  %v537_v20 = vstv %s1549_s30  ;;  %v459_v28 = vshrl.u32 %v1547_v35, 16  ;;  %v463_v24 = vsel %vm462_vm6, 1, %v1282_v57 }
  0x71   :  { %v187_v21 = vadd.f32 1.0, %v186_v5  ;;  %v194_v56 = vadd.f32 1.0, %v193_v8  ;;  %v334_v6 = vand.u32 2147483647, %v333_v17  ;;  %v461_v19 = vshrl.u32 %v456_v14, 16 }
  0x72   :  { %v465_v23 = vadd.s32 %v463_v24, %v457_v7  ;;  %vm466_vm7 = vc.u32 %v464_v45, %v460_v1  ;;  %v538_v13 = vmul.f32 %v537_v20, %v1312_v0  ;;  %v449_v3 = vadd.s32 %v448_v16, %v439_v52 }
  0x73   :  { %v195_v62 = vmul.f32 %v194_v56, %v1533_v50  ;;  %v204_v29 = vxor.u32 2147483648, %v187_v21  ;;  %v467_v26 = vsel %vm466_vm7, 1, %v1282_v57  ;;  %v337_v11 = vmul.f32 %v336_v10, %v334_v6 }
  0x74   :  { %v468_v4 = vadd.s32 %v464_v45, %v460_v1  ;;  %v469_v34 = vadd.s32 %v467_v26, %v465_v23  ;;  %vm199_vm8 = vcmp.lt.s32.totalorder %v1538_v27, 2  ;;  %v540_v37 = vstv %s1562_s4 }
  0x75   :  { %v201_v35 = vxor.u32 2147483648, %v195_v62  ;;  %v205_v36 = vsel %vm203_vm2, %v204_v29, %v195_v62  ;;  %v338_v39 = vxor.u32 2147483648, %v337_v11  ;;  %v1587_v43 = vadd.f32 %v540_v37, %v538_v13 }
  0x76   :  { %v470_v41 = vadd.s32 %v469_v34, %v459_v28  ;;  %v700_v50 = vstv %s1573_s5  ;;  %v343_v58 = vsel %vm1567_vm5, 0, %v1559_v59  ;;  %v472_v14 = vmul.u32 %v1483_v33, %v1544_v30 }
  0x77   :  { %v202_v32 = vsel %vm200_vm3, %v187_v21, %v201_v35  ;;  %v339_v18 = vsel %vm218_vm14, %v338_v39, %v337_v11  ;;  %vm474_vm9 = vc.u32 %v449_v3, %v468_v4  ;;  %v545_v54 = vand.u32 2139095040, %v1587_v43 }
  0x78   :  { %v206_v49 = vsel %vm199_vm8, %v202_v32, %v205_v36  ;;  %v471_v47 = vadd.s32 %v470_v41, %v461_v19  ;;  %v342_v27 = vsel %vm1567_vm5, %v1324_v15, %v339_v18  ;;  %v701_v59 = vmul.f32 %v700_v50, %v1312_v0 }
  0x79   :  { %v207_v53 = vsel %vm196_vm4, nan, %v206_v49  ;;  %v344_v33 = vmul.f32 %v342_v27, %v342_v27  ;;  %v542_v51 = vand.u32 2147483647, %v1587_v43  ;;  %v703_v25 = vstv %s1578_s6 }
  0x7a   :  { %1199 = vst [vmem:[%s2093_s3 + $0x1] sm:$0x1] %v207_v53  ;;  %v475_v30 = vadd.s32 1, %v471_v47  ;;  %v360_v12 = vadd.s32 3, %v343_v58  ;;  %v546_v9 = vshrl.u32 %v545_v54, 23  ;;  %v1611_v52 = vadd.f32 %v703_v25, %v701_v59 }
  0x7b   :  { %v345_v48 = vmul.f32 -0.001358992, %v344_v33  ;;  %v352_v60 = vmul.f32 -0.00019511016, %v344_v33  ;;  %v549_v1 = vand.u32 8388607, %v542_v51  ;;  %vm359_vm11 = vweird.f32 %v1324_v15 }
  0x7c   :  { %v476_v61 = vsel %vm474_vm9, %v475_v30, %v471_v47  ;;  %v1214_v31 = vadd.s32 4294967169, %v546_v9  ;;  %v361_v5 = vand.u32 3, %v360_v12  ;;  %v708_v20 = vand.u32 2139095040, %v1611_v52 }
  0x7d   :  { %v477_v63 = vadd.s32 %v476_v61, %v472_v14  ;;  %v346_v7 = vadd.f32 0.041655596, %v345_v48  ;;  %v353_v0 = vadd.f32 0.008332121, %v352_v60  ;;  %v550_v28 = vor.u32 8388608, %v549_v1 }
  0x7e   :  { %v552_v10 = vadd.s32 1, %v1214_v31  ;;  %vm362_vm12 = vcmp.lt.s32.totalorder %v361_v5, 2  ;;  %vm363_vm13 = vcmp.eq.s32.totalorder %v361_v5, 0  ;;  %vm366_vm14 = vcmp.eq.s32.totalorder %v361_v5, 2 }
  0x7f   :  { %v478_v8 = vadd.s32 536870912, %v477_v63  ;;  %v347_v16 = vmul.f32 %v346_v7, %v344_v33  ;;  %v354_v17 = vmul.f32 %v353_v0, %v344_v33  ;;  %vm381_vm15 = vcmp.lt.s32.totalorder %v1331_v22, 0 }
  0x80   :  { %vm553_vm10 = vcmp.gt.s32.totalorder %v552_v10, 0  ;;  %v473_v29 = vadd.s32 %v468_v4, %v449_v3  ;;  %v705_v11 = vand.u32 2147483647, %v1611_v52  ;;  %v1619_v36 = vshll.u32 %v550_v28, 8 }
  0x81   :  { %v479_v45 = vshrl.u32 %v478_v8, 30  ;;  %v348_v21 = vadd.f32 -0.4999988, %v347_v16  ;;  %v355_v56 = vadd.f32 -0.16666654, %v354_v17  ;;  %v554_v24 = vsel %vm553_vm10, %v552_v10, 0 }
  0x82   :  { %v556_v19 = vand.u32 31, %v554_v24  ;;  %v709_v37 = vshrl.u32 %v708_v20, 23  ;;  %v1621_v50 = vshrl.u32 %v554_v24, 5  ;;  %vm1625_vm1 = vcmp.le.f32.partialorder %v379_v2, 0.7853982 }
  0x83   :  { %v480_v6 = vshll.u32 %v479_v45, 30  ;;  %v349_v23 = vmul.f32 %v348_v21, %v344_v33  ;;  %v356_v62 = vmul.f32 %v355_v56, %v344_v33  ;;  %v503_v41 = vsub.s32 4, %v479_v45 }
  0x84   :  { %v557_v13 = vsub.s32 32, %v556_v19  ;;  %v559_v4 = vshll.u32 %v1276_v38, %v556_v19  ;;  %v562_v14 = vshll.u32 %v1277_v40, %v556_v19  ;;  %v565_v53 = vshll.u32 %v1278_v42, %v556_v19 }
  0x85   :  { %v481_v26 = vsub.s32 %v477_v63, %v480_v6  ;;  %v350_v34 = vadd.f32 1.0, %v349_v23  ;;  %v357_v35 = vadd.f32 1.0, %v356_v62  ;;  %v568_v33 = vshll.u32 %v1279_v44, %v556_v19 }
  0x86   :  { %v560_v18 = vshrl.u32 %v1277_v40, %v557_v13  ;;  %v563_v47 = vshrl.u32 %v1278_v42, %v557_v13  ;;  %v566_v2 = vshrl.u32 %v1279_v44, %v557_v13  ;;  %v569_v30 = vshrl.u32 %v1280_v46, %v557_v13 }
  0x87   :  { %vm482_vm0 = vcmp.lt.s32.totalorder %v481_v26, 0  ;;  %v483_v39 = vsub.s32 0, %v481_v26  ;;  %v358_v32 = vmul.f32 %v357_v35, %v342_v27  ;;  %v367_v58 = vxor.u32 2147483648, %v350_v34 }
  0x88   :  { %v571_v25 = vshll.u32 %v1280_v46, %v556_v19  ;;  %v572_v12 = vshrl.u32 %v1281_v55, %v557_v13  ;;  %v1220_v60 = vadd.s32 4294967169, %v709_v37  ;;  %v1643_v61 = vand.u32 8388607, %v705_v11 }
  0x89   :  { %v484_v49 = vsel %vm482_vm0, %v483_v39, %v481_v26  ;;  %v364_v54 = vxor.u32 2147483648, %v358_v32  ;;  %v368_v27 = vsel %vm366_vm14, %v367_v58, %v358_v32  ;;  %v504_v31 = vsel %vm381_vm15, %v503_v41, %v479_v45 }
  0x8a   :  { %v485_v59 = vclz %v484_v49  ;;  %v561_v7 = vor.u32 %v560_v18, %v559_v4  ;;  %v591_v0 = vand.u32 65535, %v1619_v36  ;;  %v564_v8 = vor.u32 %v563_v47, %v562_v14 }
  0x8b   :  { %v365_v9 = vsel %vm363_vm13, %v350_v34, %v364_v54  ;;  %v567_v10 = vor.u32 %v566_v2, %v565_v53  ;;  %v570_v17 = vor.u32 %v569_v30, %v568_v33  ;;  %v573_v5 = vor.u32 %v572_v12, %v571_v25 }
  0x8c   :  { %v1209_v48 = vadd.s32 4294967294, %v485_v59  ;;  %v369_v63 = vsel %vm362_vm12, %v365_v9, %v368_v27  ;;  %vm574_vm3 = vcmp.lt.s32.totalorder %v1621_v50, 1  ;;  %vm577_vm4 = vcmp.lt.s32.totalorder %v1621_v50, 4 }
  0x8d   :  { %v370_v1 = vsel %vm359_vm11, nan, %v369_v63  ;;  %v506_v15 = vsel %vm1625_vm1, 0, %v504_v31  ;;  %vm576_vm5 = vcmp.lt.s32.totalorder %v1621_v50, 3  ;;  %v592_v56 = vshrl.u32 %v1619_v36, 16 }
  0x8e   :  { %vm1210_vm2 = vcmp.lt.s32.totalorder %v1209_v48, 0  ;;  %1205 = vst [vmem:[%s2093_s3 + $0x2] sm:$0x1] %v370_v1  ;;  %v715_v28 = vadd.s32 1, %v1220_v60  ;;  %vm575_vm6 = vcmp.lt.s32.totalorder %v1621_v50, 2  ;;  %v582_v19 = vsel %vm574_vm3, %v561_v7, %v564_v8 }
  0x8f   :  { %v488_v16 = vsel %vm1210_vm2, 0, %v1209_v48  ;;  %v558_v23 = vshrl.u32 %v1276_v38, %v557_v13  ;;  %v583_v62 = vsel %vm577_vm4, %v570_v17, 920167782  ;;  %v587_v34 = vsel %vm577_vm4, %v573_v5, 1326507024 }
  0x90   :  { %v489_v20 = vsub.s32 32, %v488_v16  ;;  %v490_v45 = vshll.u32 %v481_v26, %v488_v16  ;;  %v493_v21 = vsub.s32 4294967266, %v488_v16  ;;  %v586_v26 = vsel %vm574_vm3, %v564_v8, %v567_v10 }
  0x91   :  { %v588_v39 = vsel %vm576_vm5, %v570_v17, %v587_v34  ;;  %v579_v13 = vsel %vm577_vm4, %v567_v10, 2102212464  ;;  %vm716_vm7 = vcmp.gt.s32.totalorder %v715_v28, 0  ;;  %v523_v18 = vadd.s32 3, %v506_v15 }
  0x92   :  { %v491_v24 = vshrl.u32 %v473_v29, %v489_v20  ;;  %v494_v6 = vadd.s32 127, %v493_v21  ;;  %v584_v29 = vsel %vm576_vm5, %v567_v10, %v583_v62  ;;  %v589_v32 = vsel %vm575_vm6, %v586_v26, %v588_v39 }
  0x93   :  { %v585_v41 = vsel %vm575_vm6, %v582_v19, %v584_v29  ;;  %v593_v14 = vand.u32 65535, %v589_v32  ;;  %v594_v49 = vshrl.u32 %v589_v32, 16  ;;  %v578_v47 = vsel %vm574_vm3, %v558_v23, %v561_v7 }
  0x94   :  { %v492_v35 = vor.u32 %v491_v24, %v490_v45  ;;  %v495_v37 = vshll.u32 %v494_v6, 23  ;;  %v615_v53 = vand.u32 65535, %v585_v41  ;;  %v616_v54 = vshrl.u32 %v585_v41, 16 }
  0x95   :  { %v595_v59 = vmul.u32 %v593_v14, %v591_v0  ;;  %v596_v2 = vmul.u32 %v594_v49, %v591_v0  ;;  %v597_v33 = vmul.u32 %v593_v14, %v592_v56  ;;  %v580_v30 = vsel %vm576_vm5, %v564_v8, %v579_v13 }
  0x96   :  { %v496_v58 = vor.u32 4788187, %v495_v37  ;;  %v499_v4 = vcvt.s32.f32 %v492_v35  ;;  %v617_v25 = vmul.u32 %v615_v53, %v591_v0  ;;  %v618_v12 = vmul.u32 %v616_v54, %v591_v0 }
  0x97   :  { %v619_v9 = vmul.u32 %v615_v53, %v592_v56  ;;  %v598_v60 = vmul.u32 %v594_v49, %v592_v56  ;;  %v599_v63 = vshll.u32 %v596_v2, 16  ;;  %v601_v31 = vshll.u32 %v597_v33, 16 }
  0x98   :  { %v497_v27 = vand.u32 2147483647, %v496_v58  ;;  %v600_v1 = vshrl.u32 %v596_v2, 16  ;;  %v620_v10 = vmul.u32 %v616_v54, %v592_v56  ;;  %v621_v16 = vshll.u32 %v618_v12, 16 }
  0x99   :  { %v717_v7 = vsel %vm716_vm7, %v715_v28, 0  ;;  %vm603_vm8 = vc.u32 %v595_v59, %v599_v63  ;;  %v605_v5 = vadd.s32 %v599_v63, %v595_v59  ;;  %v623_v20 = vshll.u32 %v619_v9, 16 }
  0x9a   :  { %v500_v48 = vmul.f32 %v499_v4, %v497_v27  ;;  %v604_v45 = vsel %vm603_vm8, 1, %v1282_v57  ;;  %v622_v21 = vshrl.u32 %v618_v12, 16  ;;  %vm625_vm9 = vc.u32 %v617_v25, %v621_v16 }
  0x9b   :  { %v627_v8 = vadd.s32 %v621_v16, %v617_v25  ;;  %v606_v15 = vadd.s32 %v604_v45, %v598_v60  ;;  %vm607_vm10 = vc.u32 %v605_v5, %v601_v31  ;;  %v626_v24 = vsel %vm625_vm9, 1, %v1282_v57 }
  0x9c   :  { %v501_v17 = vxor.u32 2147483648, %v500_v48  ;;  %v608_v28 = vsel %vm607_vm10, 1, %v1282_v57  ;;  %v628_v6 = vadd.s32 %v626_v24, %v620_v10  ;;  %v602_v23 = vshrl.u32 %v597_v33, 16 }
  0x9d   :  { %vm629_vm11 = vc.u32 %v627_v8, %v623_v20  ;;  %v610_v62 = vadd.s32 %v608_v28, %v606_v15  ;;  %v581_v34 = vsel %vm575_vm6, %v578_v47, %v580_v30  ;;  %v624_v35 = vshrl.u32 %v619_v9, 16 }
  0x9e   :  { %v502_v0 = vsel %vm381_vm15, %v501_v17, %v500_v48  ;;  %v630_v26 = vsel %vm629_vm11, 1, %v1282_v57  ;;  %v719_v29 = vand.u32 31, %v717_v7  ;;  %v1696_v3 = vadd.s32 %v627_v8, %v623_v20 }
  0x9f   :  { %v505_v56 = vsel %vm1625_vm1, %v1331_v22, %v502_v0  ;;  %v632_v37 = vadd.s32 %v630_v26, %v628_v6  ;;  %v611_v41 = vadd.s32 %v610_v62, %v600_v1  ;;  %v1698_v32 = vand.u32 3, %v523_v18 }
  0xa0   :  { %v507_v19 = vmul.f32 %v505_v56, %v505_v56  ;;  %v713_v4 = vor.u32 8388608, %v1643_v61  ;;  %v1701_v14 = vsub.s32 32, %v719_v29  ;;  %v635_v50 = vmul.u32 %v1619_v36, %v581_v34 }
  0xa1   :  { %v633_v58 = vadd.s32 %v632_v37, %v622_v21  ;;  %v1703_v54 = vadd.s32 %v611_v41, %v602_v23  ;;  %v1706_v27 = vshrl.u32 %v717_v7, 5  ;;  %v722_v59 = vshll.u32 %v1276_v38, %v719_v29 }
  0xa2   :  { %v508_v39 = vmul.f32 -0.001358992, %v507_v19  ;;  %v515_v13 = vmul.f32 -0.00019511016, %v507_v19  ;;  %v725_v2 = vshll.u32 %v1277_v40, %v719_v29  ;;  %v723_v61 = vshrl.u32 %v1277_v40, %v1701_v14 }
  0xa3   :  { %v634_v47 = vadd.s32 %v633_v58, %v624_v35  ;;  %vm637_vm12 = vc.u32 %v1703_v54, %v1696_v3  ;;  %v726_v25 = vshrl.u32 %v1278_v42, %v1701_v14  ;;  %v728_v36 = vshll.u32 %v1278_v42, %v719_v29 }
  0xa4   :  { %v509_v49 = vadd.f32 0.041655596, %v508_v39  ;;  %v516_v53 = vadd.f32 0.008332121, %v515_v13  ;;  %v729_v12 = vshrl.u32 %v1279_v44, %v1701_v14  ;;  %v731_v60 = vshll.u32 %v1279_v44, %v719_v29 }
  0xa5   :  { %v638_v30 = vadd.s32 1, %v634_v47  ;;  %v732_v63 = vshrl.u32 %v1280_v46, %v1701_v14  ;;  %vm525_vm13 = vcmp.lt.s32.totalorder %v1698_v32, 2  ;;  %v734_v1 = vshll.u32 %v1280_v46, %v719_v29 }
  0xa6   :  { %v510_v18 = vmul.f32 %v509_v49, %v507_v19  ;;  %v517_v33 = vmul.f32 %v516_v53, %v507_v19  ;;  %v735_v10 = vshrl.u32 %v1281_v55, %v1701_v14  ;;  %v1728_v5 = vor.u32 %v723_v61, %v722_v59 }
  0xa7   :  { %v639_v31 = vsel %vm637_vm12, %v638_v30, %v634_v47  ;;  %v1730_v20 = vor.u32 %v726_v25, %v725_v2  ;;  %v730_v45 = vor.u32 %v729_v12, %v728_v36  ;;  %v733_v21 = vor.u32 %v732_v63, %v731_v60 }
  0xa8   :  { %v511_v9 = vadd.f32 -0.4999988, %v510_v18  ;;  %v518_v48 = vadd.f32 -0.16666654, %v517_v33  ;;  %v640_v17 = vadd.s32 %v639_v31, %v635_v50  ;;  %v736_v8 = vor.u32 %v735_v10, %v734_v1 }
  0xa9   :  { %vm737_vm14 = vcmp.lt.s32.totalorder %v1706_v27, 1  ;;  %vm526_vm15 = vcmp.eq.s32.totalorder %v1698_v32, 0  ;;  %vm529_vm0 = vcmp.eq.s32.totalorder %v1698_v32, 2  ;;  %vm740_vm1 = vcmp.lt.s32.totalorder %v1706_v27, 4  ;;  %v1778_v32 = vld [vmem:[%s2092_s2] sm:$0x1] }
  0xaa   :  { %v512_v16 = vmul.f32 %v511_v9, %v507_v19  ;;  %v519_v7 = vmul.f32 %v518_v48, %v507_v19  ;;  %v641_v24 = vadd.s32 536870912, %v640_v17  ;;  %v1736_v28 = vshll.u32 %v713_v4, 8  ;;  %s1807_s2 = sld [smem:[#allocation2 + $0x7]] }
  0xab   :  { %vm739_vm2 = vcmp.lt.s32.totalorder %v1706_v27, 3  ;;  %vm738_vm3 = vcmp.lt.s32.totalorder %v1706_v27, 2  ;;  %v745_v62 = vsel %vm737_vm14, %v1728_v5, %v1730_v20  ;;  %v746_v26 = vsel %vm740_vm1, %v733_v21, 920167782 }
  0xac   :  { %v513_v0 = vadd.f32 1.0, %v512_v16  ;;  %v520_v15 = vadd.f32 1.0, %v519_v7  ;;  %v1738_v23 = vshrl.u32 %v641_v24, 30  ;;  %v750_v34 = vsel %vm740_vm1, %v736_v8, 1326507024 }
  0xad   :  { %v749_v29 = vsel %vm737_vm14, %v1730_v20, %v730_v45  ;;  %vm522_vm4 = vweird.f32 %v1331_v22  ;;  %v747_v39 = vsel %vm739_vm2, %v730_v45, %v746_v26  ;;  %v751_v13 = vsel %vm739_vm2, %v733_v21, %v750_v34 }
  0xae   :  { %v521_v6 = vmul.f32 %v520_v15, %v505_v56  ;;  %v530_v19 = vxor.u32 2147483648, %v513_v0  ;;  %v643_v37 = vshll.u32 %v1738_v23, 30  ;;  %v863_v41 = vstv %s1726_s11 }
  0xaf   :  { %v748_v49 = vsel %vm738_vm3, %v745_v62, %v747_v39  ;;  %v755_v53 = vshrl.u32 %v1736_v28, 16  ;;  %v752_v22 = vsel %vm738_vm3, %v749_v29, %v751_v13  ;;  %v754_v47 = vand.u32 65535, %v1736_v28 }
  0xb0   :  { %v527_v56 = vxor.u32 2147483648, %v521_v6  ;;  %v531_v35 = vsel %vm529_vm0, %v530_v19, %v521_v6  ;;  %v644_v4 = vsub.s32 %v640_v17, %v643_v37  ;;  %v778_v59 = vand.u32 65535, %v748_v49 }
  0xb1   :  { %v756_v33 = vand.u32 65535, %v752_v22  ;;  %v757_v61 = vshrl.u32 %v752_v22, 16  ;;  %v779_v30 = vshrl.u32 %v748_v49, 16  ;;  %v864_v25 = vmul.f32 %v1778_v32, %v863_v41 }
  0xb2   :  { %v528_v58 = vsel %vm526_vm15, %v513_v0, %v527_v56  ;;  %vm645_vm5 = vcmp.lt.s32.totalorder %v644_v4, 0  ;;  %v646_v18 = vsub.s32 0, %v644_v4  ;;  %v721_v12 = vshrl.u32 %v1276_v38, %v1701_v14 }
  0xb3   :  { %v532_v50 = vsel %vm525_vm13, %v528_v58, %v531_v35  ;;  %v742_v9 = vsel %vm740_vm1, %v730_v45, 2102212464  ;;  %v760_v48 = vmul.u32 %v756_v33, %v755_v53  ;;  %v758_v63 = vmul.u32 %v756_v33, %v754_v47 }
  0xb4   :  { %v533_v2 = vsel %vm522_vm4, nan, %v532_v50  ;;  %v647_v36 = vsel %vm645_vm5, %v646_v18, %v644_v4  ;;  %v759_v31 = vmul.u32 %v757_v61, %v754_v47  ;;  %v781_v1 = vmul.u32 %v779_v30, %v754_v47 }
  0xb5   :  { %1211 = vst [vmem:[%s2093_s3 + $0x3] sm:$0x1] %v533_v2  ;;  %v648_v60 = vclz %v647_v36  ;;  %v636_v10 = vadd.s32 %v1696_v3, %v1703_v54  ;;  %v780_v16 = vmul.u32 %v778_v59, %v754_v47  ;;  %v866_v7 = vstv %s1754_s12 }
  0xb6   :  { %v761_v21 = vmul.u32 %v757_v61, %v755_v53  ;;  %v762_v8 = vshll.u32 %v759_v31, 16  ;;  %v784_v0 = vshll.u32 %v781_v1, 16  ;;  %vm544_vm6 = vcmp.lt.s32.totalorder %v1587_v43, 0 }
  0xb7   :  { %v1215_v17 = vadd.s32 4294967294, %v648_v60  ;;  %v741_v14 = vsel %vm737_vm14, %v721_v12, %v1728_v5  ;;  %v743_v45 = vsel %vm739_vm2, %v1730_v20, %v742_v9  ;;  %v764_v15 = vshll.u32 %v760_v48, 16 }
  0xb8   :  { %v782_v24 = vmul.u32 %v778_v59, %v755_v53  ;;  %vm766_vm8 = vc.u32 %v758_v63, %v762_v8  ;;  %v768_v3 = vadd.s32 %v762_v8, %v758_v63  ;;  %v1795_v54 = vadd.f32 %v866_v7, %v864_v25 }
  0xb9   :  { %vm1216_vm7 = vcmp.lt.s32.totalorder %v1215_v17, 0  ;;  %v767_v19 = vsel %vm766_vm8, 1, %v1282_v57  ;;  %v783_v62 = vmul.u32 %v779_v30, %v755_v53  ;;  %vm788_vm9 = vc.u32 %v780_v16, %v784_v0 }
  0xba   :  { %v651_v6 = vsel %vm1216_vm7, 0, %v1215_v17  ;;  %v769_v5 = vadd.s32 %v767_v19, %v761_v21  ;;  %v666_v35 = vsub.s32 4, %v1738_v23  ;;  %v763_v37 = vshrl.u32 %v759_v31, 16 }
  0xbb   :  { %v652_v26 = vsub.s32 32, %v651_v6  ;;  %v653_v34 = vshll.u32 %v644_v4, %v651_v6  ;;  %v656_v56 = vsub.s32 4294967266, %v651_v6  ;;  %vm770_vm10 = vc.u32 %v768_v3, %v764_v15 }
  0xbc   :  { %v786_v20 = vshll.u32 %v782_v24, 16  ;;  %v771_v13 = vsel %vm770_vm10, 1, %v1282_v57  ;;  %v789_v41 = vsel %vm788_vm9, 1, %v1282_v57  ;;  %v790_v49 = vadd.s32 %v784_v0, %v780_v16 }
  0xbd   :  { %v654_v29 = vshrl.u32 %v636_v10, %v652_v26  ;;  %v657_v39 = vadd.s32 127, %v656_v56  ;;  %v773_v58 = vadd.s32 %v771_v13, %v769_v5  ;;  %v791_v50 = vadd.s32 %v789_v41, %v783_v62 }
  0xbe   :  { %v871_v53 = vand.u32 2139095040, %v1795_v54  ;;  %v765_v47 = vshrl.u32 %v760_v48, 16  ;;  %v785_v59 = vshrl.u32 %v781_v1, 16  ;;  %vm792_vm11 = vc.u32 %v790_v49, %v786_v20 }
  0xbf   :  { %v655_v22 = vor.u32 %v654_v29, %v653_v34  ;;  %v658_v4 = vshll.u32 %v657_v39, 23  ;;  %v774_v2 = vadd.s32 %v773_v58, %v763_v37  ;;  %v868_v18 = vand.u32 2147483647, %v1795_v54 }
  0xc0   :  { %v872_v33 = vshrl.u32 %v871_v53, 23  ;;  %v667_v25 = vsel %vm544_vm6, %v666_v35, %v1738_v23  ;;  %v793_v36 = vsel %vm792_vm11, 1, %v1282_v57  ;;  %vm1811_vm12 = vcmp.le.f32.partialorder %v542_v51, 0.7853982 }
  0xc1   :  { %v659_v61 = vor.u32 4788187, %v658_v4  ;;  %v662_v30 = vcvt.s32.f32 %v655_v22  ;;  %v787_v9 = vshrl.u32 %v782_v24, 16  ;;  %v795_v48 = vadd.s32 %v793_v36, %v791_v50 }
  0xc2   :  { %v1226_v60 = vadd.s32 4294967169, %v872_v33  ;;  %v744_v31 = vsel %vm738_vm3, %v741_v14, %v743_v45  ;;  %v1817_v1 = vadd.s32 %v774_v2, %v765_v47  ;;  %v1819_v23 = vadd.s32 %v790_v49, %v786_v20 }
  0xc3   :  { %v660_v63 = vand.u32 2147483647, %v659_v61  ;;  %v669_v10 = vsel %vm1811_vm12, 0, %v667_v25  ;;  %v796_v16 = vadd.s32 %v795_v48, %v785_v59  ;;  %v875_v51 = vand.u32 8388607, %v868_v18 }
  0xc4   :  { %v878_v7 = vadd.s32 1, %v1226_v60  ;;  %v798_v8 = vmul.u32 %v1736_v28, %v744_v31  ;;  %v686_v0 = vadd.s32 3, %v669_v10  ;;  %vm800_vm14 = vc.u32 %v1817_v1, %v1819_v23 }
  0xc5   :  { %v663_v17 = vmul.f32 %v662_v30, %v660_v63  ;;  %v797_v21 = vadd.s32 %v796_v16, %v787_v9  ;;  %v876_v15 = vor.u32 8388608, %v875_v51  ;;  %v1026_v6 = vstv %s1807_s2 }
  0xc6   :  { %vm879_vm13 = vcmp.gt.s32.totalorder %v878_v7, 0  ;;  %v1838_v34 = vand.u32 3, %v686_v0  ;;  %v1027_v20 = vmul.f32 %v1778_v32, %v1026_v6  ;;  %v1029_v61 = vstv %s1828_s17 }
  0xc7   :  { %v664_v27 = vxor.u32 2147483648, %v663_v17  ;;  %v880_v14 = vsel %vm879_vm13, %v878_v7, 0  ;;  %v801_v45 = vadd.s32 1, %v797_v21  ;;  %v1843_v37 = vshll.u32 %v876_v15, 8 }
  0xc8   :  { %v882_v24 = vand.u32 31, %v880_v14  ;;  %v1840_v5 = vshrl.u32 %v880_v14, 5  ;;  %vm692_vm15 = vcmp.eq.s32.totalorder %v1838_v34, 2  ;;  %vm688_vm1 = vcmp.lt.s32.totalorder %v1838_v34, 2 }
  0xc9   :  { %v665_v3 = vsel %vm544_vm6, %v664_v27, %v663_v17  ;;  %v802_v19 = vsel %vm800_vm14, %v801_v45, %v797_v21  ;;  %vm685_vm3 = vweird.f32 %v1587_v43  ;;  %v1879_v51 = vand.u32 65535, %v1843_v37 }
  0xca   :  { %v668_v28 = vsel %vm1811_vm12, %v1587_v43, %v665_v3  ;;  %v1836_v62 = vsub.s32 32, %v882_v24  ;;  %v803_v56 = vadd.s32 %v802_v19, %v798_v8  ;;  %v888_v35 = vshll.u32 %v1277_v40, %v882_v24 }
  0xcb   :  { %v670_v26 = vmul.f32 %v668_v28, %v668_v28  ;;  %v891_v58 = vshll.u32 %v1278_v42, %v882_v24  ;;  %v894_v50 = vshll.u32 %v1279_v44, %v882_v24  ;;  %v897_v47 = vshll.u32 %v1280_v46, %v882_v24 }
  0xcc   :  { %v804_v13 = vadd.s32 536870912, %v803_v56  ;;  %v889_v41 = vshrl.u32 %v1278_v42, %v1836_v62  ;;  %v892_v49 = vshrl.u32 %v1279_v44, %v1836_v62  ;;  %v895_v53 = vshrl.u32 %v1280_v46, %v1836_v62 }
  0xcd   :  { %v671_v29 = vmul.f32 -0.001358992, %v670_v26  ;;  %v678_v39 = vmul.f32 -0.00019511016, %v670_v26  ;;  %v885_v59 = vshll.u32 %v1276_v38, %v882_v24  ;;  %v886_v2 = vshrl.u32 %v1277_v40, %v1836_v62 }
  0xce   :  { %v1854_v32 = vshrl.u32 %v804_v13, 30  ;;  %v898_v33 = vshrl.u32 %v1281_v55, %v1836_v62  ;;  %v1865_v12 = vor.u32 %v889_v41, %v888_v35  ;;  %v1867_v9 = vor.u32 %v892_v49, %v891_v58 }
  0xcf   :  { %v672_v22 = vadd.f32 0.041655596, %v671_v29  ;;  %v679_v4 = vadd.f32 0.008332121, %v678_v39  ;;  %v896_v48 = vor.u32 %v895_v53, %v894_v50  ;;  %vm900_vm0 = vcmp.lt.s32.totalorder %v1840_v5, 1 }
  0xd0   :  { %v806_v36 = vshll.u32 %v1854_v32, 30  ;;  %v899_v60 = vor.u32 %v898_v33, %v897_v47  ;;  %vm903_vm2 = vcmp.lt.s32.totalorder %v1840_v5, 4  ;;  %v1875_v16 = vor.u32 %v886_v2, %v885_v59 }
  0xd1   :  { %v673_v30 = vmul.f32 %v672_v22, %v670_v26  ;;  %v680_v25 = vmul.f32 %v679_v4, %v670_v26  ;;  %vm902_vm4 = vcmp.lt.s32.totalorder %v1840_v5, 3  ;;  %v1881_v7 = vadd.f32 %v1029_v61, %v1027_v20 }
  0xd2   :  { %v1871_v10 = vsub.s32 %v803_v56, %v806_v36  ;;  %vm707_vm6 = vcmp.lt.s32.totalorder %v1611_v52, 0  ;;  %vm901_vm7 = vcmp.lt.s32.totalorder %v1840_v5, 2  ;;  %v909_v27 = vsel %vm903_vm2, %v896_v48, 920167782 }
  0xd3   :  { %v674_v63 = vadd.f32 -0.4999988, %v673_v30  ;;  %v681_v31 = vadd.f32 -0.16666654, %v680_v25  ;;  %v912_v0 = vsel %vm900_vm0, %v1865_v12, %v1867_v9  ;;  %v913_v14 = vsel %vm903_vm2, %v899_v60, 1326507024 }
  0xd4   :  { %vm808_vm5 = vcmp.lt.s32.totalorder %v1871_v10, 0  ;;  %v809_v8 = vsub.s32 0, %v1871_v10  ;;  %v918_v3 = vshrl.u32 %v1843_v37, 16  ;;  %v908_v19 = vsel %vm900_vm0, %v1875_v16, %v1865_v12 }
  0xd5   :  { %v675_v17 = vmul.f32 %v674_v63, %v670_v26  ;;  %v682_v21 = vmul.f32 %v681_v31, %v670_v26  ;;  %v914_v26 = vsel %vm902_vm4, %v896_v48, %v913_v14  ;;  %v1034_v56 = vand.u32 2139095040, %v1881_v7 }
  0xd6   :  { %v810_v24 = vsel %vm808_vm5, %v809_v8, %v1871_v10  ;;  %v910_v29 = vsel %vm902_vm4, %v1867_v9, %v909_v27  ;;  %v915_v39 = vsel %vm901_vm7, %v912_v0, %v914_v26  ;;  %vm689_vm8 = vcmp.eq.s32.totalorder %v1838_v34, 0 }
  0xd7   :  { %v676_v45 = vadd.f32 1.0, %v675_v17  ;;  %v683_v15 = vadd.f32 1.0, %v682_v21  ;;  %v811_v6 = vclz %v810_v24  ;;  %v919_v41 = vand.u32 65535, %v915_v39 }
  0xd8   :  { %v920_v58 = vshrl.u32 %v915_v39, 16  ;;  %v829_v53 = vsub.s32 4, %v1854_v32  ;;  %v911_v22 = vsel %vm901_vm7, %v908_v19, %v910_v29  ;;  %v1035_v47 = vshrl.u32 %v1034_v56, 23 }
  0xd9   :  { %v684_v35 = vmul.f32 %v683_v15, %v668_v28  ;;  %v693_v20 = vxor.u32 2147483648, %v676_v45  ;;  %v1221_v13 = vadd.s32 4294967294, %v811_v6  ;;  %v799_v28 = vadd.s32 %v1819_v23, %v1817_v1 }
  0xda   :  { %v922_v4 = vmul.u32 %v920_v58, %v1879_v51  ;;  %vm1920_vm10 = vcmp.le.f32.partialorder %v705_v11, 0.7853982  ;;  %v921_v61 = vmul.u32 %v919_v41, %v1879_v51  ;;  %v923_v1 = vmul.u32 %v919_v41, %v918_v3 }
  0xdb   :  { %v690_v49 = vxor.u32 2147483648, %v684_v35  ;;  %v694_v50 = vsel %vm692_vm15, %v693_v20, %v684_v35  ;;  %vm1222_vm9 = vcmp.lt.s32.totalorder %v1221_v13, 0  ;;  %v830_v11 = vsel %vm707_vm6, %v829_v53, %v1854_v32 }
  0xdc   :  { %v814_v33 = vsel %vm1222_vm9, 0, %v1221_v13  ;;  %v884_v60 = vshrl.u32 %v1276_v38, %v1836_v62  ;;  %v941_v63 = vand.u32 65535, %v911_v22  ;;  %v924_v17 = vmul.u32 %v920_v58, %v918_v3 }
  0xdd   :  { %v691_v59 = vsel %vm689_vm8, %v676_v45, %v690_v49  ;;  %v815_v30 = vsub.s32 32, %v814_v33  ;;  %v816_v25 = vshll.u32 %v1871_v10, %v814_v33  ;;  %v819_v36 = vsub.s32 4294967266, %v814_v33 }
  0xde   :  { %v695_v23 = vsel %vm688_vm1, %v691_v59, %v694_v50  ;;  %v925_v10 = vshll.u32 %v922_v4, 16  ;;  %v905_v43 = vsel %vm903_vm2, %v1867_v9, 2102212464  ;;  %v926_v21 = vshrl.u32 %v922_v4, 16 }
  0xdf   :  { %v696_v48 = vsel %vm685_vm3, nan, %v695_v23  ;;  %v817_v34 = vshrl.u32 %v799_v28, %v815_v30  ;;  %v820_v31 = vadd.s32 127, %v819_v36  ;;  %v927_v8 = vshll.u32 %v923_v1, 16 }
  0xe0   :  { %1217 = vst [vmem:[%s2093_s3 + $0x4] sm:$0x1] %v696_v48  ;;  %v942_v27 = vshrl.u32 %v911_v22, 16  ;;  %vm929_vm11 = vc.u32 %v921_v61, %v925_v10  ;;  %v931_v62 = vadd.s32 %v925_v10, %v921_v61  ;;  %v943_v45 = vmul.u32 %v941_v63, %v1879_v51 }
  0xe1   :  { %v818_v32 = vor.u32 %v817_v34, %v816_v25  ;;  %v821_v0 = vshll.u32 %v820_v31, 23  ;;  %v930_v14 = vsel %vm929_vm11, 1, %v1282_v57  ;;  %v945_v24 = vmul.u32 %v941_v63, %v918_v3 }
  0xe2   :  { %v944_v15 = vmul.u32 %v942_v27, %v1879_v51  ;;  %v932_v26 = vadd.s32 %v930_v14, %v924_v17  ;;  %vm933_vm12 = vc.u32 %v931_v62, %v927_v8  ;;  %v904_v9 = vsel %vm900_vm0, %v884_v60, %v1875_v16 }
  0xe3   :  { %v822_v6 = vor.u32 4788187, %v821_v0  ;;  %v825_v19 = vcvt.s32.f32 %v818_v32  ;;  %v934_v56 = vsel %vm933_vm12, 1, %v1282_v57  ;;  %v946_v35 = vmul.u32 %v942_v27, %v918_v3 }
  0xe4   :  { %v947_v20 = vshll.u32 %v944_v15, 16  ;;  %v832_v39 = vsel %vm1920_vm10, 0, %v830_v11  ;;  %v936_v13 = vadd.s32 %v934_v56, %v932_v26  ;;  %v949_v41 = vshll.u32 %v945_v24, 16 }
  0xe5   :  { %v823_v29 = vand.u32 2147483647, %v822_v6  ;;  %v906_v51 = vsel %vm902_vm4, %v1865_v12, %v905_v43  ;;  %v1232_v49 = vadd.s32 4294967169, %v1035_v47  ;;  %v928_v28 = vshrl.u32 %v923_v1, 16 }
  0xe6   :  { %vm951_vm13 = vc.u32 %v943_v45, %v947_v20  ;;  %v953_v58 = vadd.s32 %v947_v20, %v943_v45  ;;  %v937_v16 = vadd.s32 %v936_v13, %v926_v21  ;;  %v948_v3 = vshrl.u32 %v944_v15, 16 }
  0xe7   :  { %v826_v50 = vmul.f32 %v825_v19, %v823_v29  ;;  %v952_v53 = vsel %vm951_vm13, 1, %v1282_v57  ;;  %v1031_v33 = vand.u32 2147483647, %v1881_v7  ;;  %v1041_v61 = vadd.s32 1, %v1232_v49 }
  0xe8   :  { %v954_v22 = vadd.s32 %v952_v53, %v946_v35  ;;  %vm955_vm14 = vc.u32 %v953_v58, %v949_v41  ;;  %v849_v23 = vadd.s32 3, %v832_v39  ;;  %v907_v12 = vsel %vm901_vm7, %v904_v9, %v906_v51 }
  0xe9   :  { %v827_v4 = vxor.u32 2147483648, %v826_v50  ;;  %v956_v59 = vsel %vm955_vm14, 1, %v1282_v57  ;;  %v950_v30 = vshrl.u32 %v945_v24, 16  ;;  %v1960_v25 = vadd.s32 %v937_v16, %v928_v28 }
  0xea   :  { %v958_v47 = vadd.s32 %v956_v59, %v954_v22  ;;  %v1962_v36 = vadd.s32 %v953_v58, %v949_v41  ;;  %vm1042_vm15 = vcmp.gt.s32.totalorder %v1041_v61, 0  ;;  %v1967_v5 = vand.u32 3, %v849_v23 }
  0xeb   :  { %v828_v1 = vsel %vm707_vm6, %v827_v4, %v826_v50  ;;  %v1043_v60 = vsel %vm1042_vm15, %v1041_v61, 0  ;;  %v961_v17 = vmul.u32 %v1843_v37, %v907_v12  ;;  %v1038_v10 = vand.u32 8388607, %v1031_v33 }
  0xec   :  { %v831_v48 = vsel %vm1920_vm10, %v1611_v52, %v828_v1  ;;  %v959_v11 = vadd.s32 %v958_v47, %v948_v3  ;;  %v1045_v34 = vand.u32 31, %v1043_v60  ;;  %vm963_vm0 = vc.u32 %v1960_v25, %v1962_v36 }
  0xed   :  { %v833_v63 = vmul.f32 %v831_v48, %v831_v48  ;;  %v1988_v35 = vshrl.u32 %v1043_v60, 5  ;;  %vm852_vm1 = vcmp.eq.s32.totalorder %v1967_v5, 0  ;;  %vm851_vm2 = vcmp.lt.s32.totalorder %v1967_v5, 2 }
  0xee   :  { %v960_v31 = vadd.s32 %v959_v11, %v950_v30  ;;  %v1974_v8 = vsub.s32 32, %v1045_v34  ;;  %v1048_v27 = vshll.u32 %v1276_v38, %v1045_v34  ;;  %v1051_v32 = vshll.u32 %v1277_v40, %v1045_v34 }
  0xef   :  { %v834_v43 = vmul.f32 -0.001358992, %v833_v63  ;;  %v841_v21 = vmul.f32 -0.00019511016, %v833_v63  ;;  %v1054_v0 = vshll.u32 %v1278_v42, %v1045_v34  ;;  %v1057_v45 = vshll.u32 %v1279_v44, %v1045_v34 }
  0xf0   :  { %v964_v2 = vadd.s32 1, %v960_v31  ;;  %v1049_v37 = vshrl.u32 %v1277_v40, %v1974_v8  ;;  %v1052_v24 = vshrl.u32 %v1278_v42, %v1974_v8  ;;  %v1055_v6 = vshrl.u32 %v1279_v44, %v1974_v8 }
  0xf1   :  { %v835_v62 = vadd.f32 0.041655596, %v834_v43  ;;  %v842_v14 = vadd.f32 0.008332121, %v841_v21  ;;  %v1058_v19 = vshrl.u32 %v1280_v46, %v1974_v8  ;;  %v1039_v40 = vor.u32 8388608, %v1038_v10 }
  0xf2   :  { %v965_v15 = vsel %vm963_vm0, %v964_v2, %v960_v31  ;;  %v1991_v20 = vor.u32 %v1049_v37, %v1048_v27  ;;  %v1994_v13 = vor.u32 %v1052_v24, %v1051_v32  ;;  %v1996_v44 = vor.u32 %v1055_v6, %v1054_v0 }
  0xf3   :  { %v836_v26 = vmul.f32 %v835_v62, %v833_v63  ;;  %v843_v9 = vmul.f32 %v842_v14, %v833_v63  ;;  %v966_v56 = vadd.s32 %v965_v15, %v961_v17  ;;  %v1059_v41 = vor.u32 %v1058_v19, %v1057_v45 }
  0xf4   :  { %v1060_v51 = vshll.u32 %v1280_v46, %v1045_v34  ;;  %v1061_v58 = vshrl.u32 %v1281_v55, %v1974_v8  ;;  %vm1063_vm3 = vcmp.lt.s32.totalorder %v1988_v35, 1  ;;  %vm855_vm4 = vcmp.eq.s32.totalorder %v1967_v5, 2 }
  0xf5   :  { %v837_v29 = vadd.f32 -0.4999988, %v836_v26  ;;  %v844_v39 = vadd.f32 -0.16666654, %v843_v9  ;;  %v967_v42 = vadd.s32 536870912, %v966_v56  ;;  %vm1066_vm5 = vcmp.lt.s32.totalorder %v1988_v35, 4 }
  0xf6   :  { %v1062_v16 = vor.u32 %v1061_v58, %v1060_v51  ;;  %v2006_v53 = vshll.u32 %v1039_v40, 8  ;;  %vm1065_vm6 = vcmp.lt.s32.totalorder %v1988_v35, 3  ;;  %vm1064_vm7 = vcmp.lt.s32.totalorder %v1988_v35, 2 }
  0xf7   :  { %v838_v49 = vmul.f32 %v837_v29, %v833_v63  ;;  %v845_v50 = vmul.f32 %v844_v39, %v833_v63  ;;  %v2001_v28 = vshrl.u32 %v967_v42, 30  ;;  %v1071_v55 = vsel %vm1063_vm3, %v1991_v20, %v1994_v13 }
  0xf8   :  { %v1072_v4 = vsel %vm1066_vm5, %v1059_v41, 920167782  ;;  %v1076_v59 = vsel %vm1066_vm5, %v1062_v16, 1326507024  ;;  %v1075_v30 = vsel %vm1063_vm3, %v1994_v13, %v1996_v44  ;;  %v1080_v11 = vand.u32 65535, %v2006_v53 }
  0xf9   :  { %v839_v3 = vadd.f32 1.0, %v838_v49  ;;  %v846_v22 = vadd.f32 1.0, %v845_v50  ;;  %v969_v46 = vshll.u32 %v2001_v28, 30  ;;  %v1073_v47 = vsel %vm1065_vm6, %v1996_v44, %v1072_v4 }
  0xfa   :  { %v1077_v1 = vsel %vm1065_vm6, %v1059_v41, %v1076_v59  ;;  %v1081_v60 = vshrl.u32 %v2006_v53, 16  ;;  %vm848_vm9 = vweird.f32 %v1611_v52  ;;  %v1074_v31 = vsel %vm1064_vm7, %v1071_v55, %v1073_v47 }
  0xfb   :  { %v847_v61 = vmul.f32 %v846_v22, %v831_v48  ;;  %v856_v23 = vxor.u32 2147483648, %v839_v3  ;;  %v970_v12 = vsub.s32 %v966_v56, %v969_v46  ;;  %v1078_v17 = vsel %vm1064_vm7, %v1075_v30, %v1077_v1 }
  0xfc   :  { %v1082_v21 = vand.u32 65535, %v1078_v17  ;;  %v1083_v2 = vshrl.u32 %v1078_v17, 16  ;;  %v1104_v0 = vand.u32 65535, %v1074_v31  ;;  %v1105_v62 = vshrl.u32 %v1074_v31, 16 }
  0xfd   :  { %v853_v63 = vxor.u32 2147483648, %v847_v61  ;;  %v857_v48 = vsel %vm855_vm4, %v856_v23, %v847_v61  ;;  %vm971_vm8 = vcmp.lt.s32.totalorder %v970_v12, 0  ;;  %v972_v34 = vsub.s32 0, %v970_v12 }
  0xfe   :  { %v1084_v52 = vmul.u32 %v1082_v21, %v1080_v11  ;;  %v1085_v37 = vmul.u32 %v1083_v2, %v1080_v11  ;;  %v1086_v45 = vmul.u32 %v1082_v21, %v1081_v60  ;;  %v1087_v24 = vmul.u32 %v1083_v2, %v1081_v60 }
  0xff   :  { %v854_v10 = vsel %vm852_vm1, %v839_v3, %v853_v63  ;;  %v973_v43 = vsel %vm971_vm8, %v972_v34, %v970_v12  ;;  %v962_v19 = vadd.s32 %v1962_v36, %v1960_v25  ;;  %v1107_v26 = vmul.u32 %v1105_v62, %v1080_v11 }
 0x100   :  { %v858_v27 = vsel %vm851_vm2, %v854_v10, %v857_v48  ;;  %v974_v32 = vclz %v973_v43  ;;  %v1088_v6 = vshll.u32 %v1085_v37, 16  ;;  %v1090_v5 = vshll.u32 %v1086_v45, 16 }
 0x101   :  { %v859_v14 = vsel %vm848_vm9, nan, %v858_v27  ;;  %v1108_v40 = vmul.u32 %v1104_v0, %v1081_v60  ;;  %v1106_v58 = vmul.u32 %v1104_v0, %v1080_v11  ;;  %v1089_v16 = vshrl.u32 %v1085_v37, 16 }
 0x102   :  { %1223 = vst [vmem:[%s2093_s3 + $0x5] sm:$0x1] %v859_v14  ;;  %v1227_v15 = vadd.s32 4294967294, %v974_v32  ;;  %vm1092_vm11 = vc.u32 %v1084_v52, %v1088_v6  ;;  %v1094_v56 = vadd.s32 %v1088_v6, %v1084_v52  ;;  %v1109_v36 = vmul.u32 %v1105_v62, %v1081_v60 }
 0x103   :  { %v1093_v41 = vsel %vm1092_vm11, 1, %v1282_v57  ;;  %v1110_v3 = vshll.u32 %v1107_v26, 16  ;;  %v1112_v22 = vshll.u32 %v1108_v40, 16  ;;  %v1047_v4 = vshrl.u32 %v1276_v38, %v1974_v8 }
 0x104   :  { %vm1228_vm10 = vcmp.lt.s32.totalorder %v1227_v15, 0  ;;  %v1095_v51 = vadd.s32 %v1093_v41, %v1087_v24  ;;  %vm1096_vm12 = vc.u32 %v1094_v56, %v1090_v5  ;;  %v1068_v61 = vsel %vm1066_vm5, %v1996_v44, 2102212464 }
 0x105   :  { %v977_v9 = vsel %vm1228_vm10, 0, %v1227_v15  ;;  %v1097_v25 = vsel %vm1096_vm12, 1, %v1282_v57  ;;  %v1091_v23 = vshrl.u32 %v1086_v45, 16  ;;  %vm1114_vm13 = vc.u32 %v1106_v58, %v1110_v3 }
 0x106   :  { %v978_v29 = vsub.s32 32, %v977_v9  ;;  %v979_v39 = vshll.u32 %v970_v12, %v977_v9  ;;  %v982_v42 = vsub.s32 4294967266, %v977_v9  ;;  %v1099_v59 = vadd.s32 %v1097_v25, %v1095_v51 }
 0x107   :  { %v1116_v12 = vadd.s32 %v1110_v3, %v1106_v58  ;;  %v1115_v11 = vsel %vm1114_vm13, 1, %v1282_v57  ;;  %v1111_v60 = vshrl.u32 %v1107_v26, 16  ;;  %v1067_v38 = vsel %vm1063_vm3, %v1047_v4, %v1991_v20 }
 0x108   :  { %v980_v49 = vshrl.u32 %v962_v19, %v978_v29  ;;  %v983_v50 = vadd.s32 127, %v982_v42  ;;  %v1100_v1 = vadd.s32 %v1099_v59, %v1089_v16  ;;  %v1117_v63 = vadd.s32 %v1115_v11, %v1109_v36 }
 0x109   :  { %vm1118_vm14 = vc.u32 %v1116_v12, %v1112_v22  ;;  %v1069_v8 = vsel %vm1065_vm6, %v1994_v13, %v1068_v61  ;;  %v1113_v34 = vshrl.u32 %v1108_v40, 16  ;;  %v1120_v43 = vadd.s32 %v1116_v12, %v1112_v22 }
 0x10a   :  { %v981_v46 = vor.u32 %v980_v49, %v979_v39  ;;  %v984_v55 = vshll.u32 %v983_v50, 23  ;;  %v1119_v44 = vsel %vm1118_vm14, 1, %v1282_v57  ;;  %v1101_v10 = vadd.s32 %v1100_v1, %v1091_v23 }
 0x10b   :  { %v1121_v31 = vadd.s32 %v1119_v44, %v1117_v63  ;;  %vm870_vm15 = vcmp.lt.s32.totalorder %v1795_v54, 0  ;;  %v992_v21 = vsub.s32 4, %v2001_v28  ;;  %v1070_v2 = vsel %vm1064_vm7, %v1067_v38, %v1069_v8 }
 0x10c   :  { %v985_v30 = vor.u32 4788187, %v984_v55  ;;  %v988_v47 = vcvt.s32.f32 %v981_v46  ;;  %vm2067_vm0 = vcmp.le.f32.partialorder %v868_v18, 0.7853982  ;;  %v1124_v0 = vmul.u32 %v2006_v53, %v1070_v2 }
 0x10d   :  { %v1122_v27 = vadd.s32 %v1121_v31, %v1111_v60  ;;  %vm1126_vm1 = vc.u32 %v1101_v10, %v1120_v43  ;;  %v993_v62 = vsel %vm870_vm15, %v992_v21, %v2001_v28  ;;  %vm1011_vm6 = vweird.f32 %v1795_v54 }
 0x10e   :  { %v986_v48 = vand.u32 2147483647, %v985_v30  ;;  %v995_v18 = vsel %vm2067_vm0, 0, %v993_v62  ;;  %v1125_v61 = vadd.s32 %v1120_v43, %v1101_v10  ;;  %vm1033_vm8 = vcmp.lt.s32.totalorder %v1881_v7, 0 }
 0x10f   :  { %v1123_v13 = vadd.s32 %v1122_v27, %v1113_v34  ;;  %v1012_v53 = vadd.s32 3, %v995_v18  ;;  %vm1032_vm9 = vcmp.le.f32.partialorder %v1031_v33, 0.7853982  ;;  %vm1174_vm13 = vweird.f32 %v1881_v7 }
 0x110   :  { %v989_v17 = vmul.f32 %v988_v47, %v986_v48 }
 0x111   :  { %v1127_v14 = vadd.s32 1, %v1123_v13  ;;  %v1013_v39 = vand.u32 3, %v1012_v53 }
 0x112   :  { %v990_v57 = vxor.u32 2147483648, %v989_v17 }
 0x113   :  { %v1128_v37 = vsel %vm1126_vm1, %v1127_v14, %v1123_v13  ;;  %vm1018_vm3 = vcmp.eq.s32.totalorder %v1013_v39, 2  ;;  %vm1015_vm4 = vcmp.eq.s32.totalorder %v1013_v39, 0  ;;  %vm1014_vm5 = vcmp.lt.s32.totalorder %v1013_v39, 2 }
 0x114   :  { %v991_v32 = vsel %vm870_vm15, %v990_v57, %v989_v17  ;;  %v1129_v24 = vadd.s32 %v1128_v37, %v1124_v0 }
 0x115   :  { %v994_v35 = vsel %vm2067_vm0, %v1795_v54, %v991_v32 }
 0x116   :  { %v996_v52 = vmul.f32 %v994_v35, %v994_v35  ;;  %v1130_v5 = vadd.s32 536870912, %v1129_v24 }
 0x118   :  { %v997_v45 = vmul.f32 -0.001358992, %v996_v52  ;;  %v1004_v15 = vmul.f32 -0.00019511016, %v996_v52  ;;  %v1131_v28 = vshrl.u32 %v1130_v5, 30 }
 0x11a   :  { %v998_v6 = vadd.f32 0.041655596, %v997_v45  ;;  %v1005_v19 = vadd.f32 0.008332121, %v1004_v15  ;;  %v1132_v29 = vshll.u32 %v1131_v28, 30  ;;  %v1155_v34 = vsub.s32 4, %v1131_v28 }
 0x11c   :  { %v999_v26 = vmul.f32 %v998_v6, %v996_v52  ;;  %v1006_v9 = vmul.f32 %v1005_v19, %v996_v52  ;;  %v1133_v51 = vsub.s32 %v1129_v24, %v1132_v29  ;;  %v1156_v10 = vsel %vm1033_vm8, %v1155_v34, %v1131_v28 }
 0x11d   :  { %v1158_v2 = vsel %vm1032_vm9, 0, %v1156_v10 }
 0x11e   :  { %v1000_v56 = vadd.f32 -0.4999988, %v999_v26  ;;  %v1007_v40 = vadd.f32 -0.16666654, %v1006_v9  ;;  %vm1134_vm2 = vcmp.lt.s32.totalorder %v1133_v51, 0  ;;  %v1135_v50 = vsub.s32 0, %v1133_v51 }
 0x11f   :  { %v1175_v32 = vadd.s32 3, %v1158_v2 }
 0x120   :  { %v1001_v42 = vmul.f32 %v1000_v56, %v996_v52  ;;  %v1008_v41 = vmul.f32 %v1007_v40, %v996_v52  ;;  %v1136_v36 = vsel %vm1134_vm2, %v1135_v50, %v1133_v51 }
 0x121   :  { %v1137_v3 = vclz %v1136_v36  ;;  %v1176_v52 = vand.u32 3, %v1175_v32 }
 0x122   :  { %v1002_v58 = vadd.f32 1.0, %v1001_v42  ;;  %v1009_v49 = vadd.f32 1.0, %v1008_v41 }
 0x123   :  { %v1233_v55 = vadd.s32 4294967294, %v1137_v3  ;;  %vm1181_vm10 = vcmp.eq.s32.totalorder %v1176_v52, 2  ;;  %vm1178_vm11 = vcmp.eq.s32.totalorder %v1176_v52, 0  ;;  %vm1177_vm12 = vcmp.lt.s32.totalorder %v1176_v52, 2 }
 0x124   :  { %v1010_v16 = vmul.f32 %v1009_v49, %v994_v35  ;;  %v1019_v25 = vxor.u32 2147483648, %v1002_v58 }
 0x125   :  { %vm1234_vm7 = vcmp.lt.s32.totalorder %v1233_v55, 0 }
 0x126   :  { %v1016_v22 = vxor.u32 2147483648, %v1010_v16  ;;  %v1020_v46 = vsel %vm1018_vm3, %v1019_v25, %v1010_v16  ;;  %v1140_v12 = vsel %vm1234_vm7, 0, %v1233_v55 }
 0x127   :  { %v1141_v30 = vsub.s32 32, %v1140_v12  ;;  %v1142_v47 = vshll.u32 %v1133_v51, %v1140_v12  ;;  %v1145_v1 = vsub.s32 4294967266, %v1140_v12 }
 0x128   :  { %v1017_v4 = vsel %vm1015_vm4, %v1002_v58, %v1016_v22 }
 0x129   :  { %v1021_v59 = vsel %vm1014_vm5, %v1017_v4, %v1020_v46  ;;  %v1143_v11 = vshrl.u32 %v1125_v61, %v1141_v30  ;;  %v1146_v60 = vadd.s32 127, %v1145_v1 }
 0x12a   :  { %v1022_v23 = vsel %vm1011_vm6, nan, %v1021_v59 }
 0x12b   :  { %1229 = vst [vmem:[%s2093_s3 + $0x6] sm:$0x1] %v1022_v23  ;;  %v1144_v63 = vor.u32 %v1143_v11, %v1142_v47  ;;  %v1147_v48 = vshll.u32 %v1146_v60, 23 }
 0x12d   :  { %v1148_v38 = vor.u32 4788187, %v1147_v48  ;;  %v1151_v54 = vcvt.s32.f32 %v1144_v63 }
 0x12f   :  { %v1149_v8 = vand.u32 2147483647, %v1148_v38 }
 0x131   :  { %v1152_v44 = vmul.f32 %v1151_v54, %v1149_v8 }
 0x133   :  { %v1153_v31 = vxor.u32 2147483648, %v1152_v44 }
 0x135   :  { %v1154_v17 = vsel %vm1033_vm8, %v1153_v31, %v1152_v44 }
 0x136   :  { %v1157_v43 = vsel %vm1032_vm9, %v1881_v7, %v1154_v17 }
 0x137   :  { %v1159_v21 = vmul.f32 %v1157_v43, %v1157_v43 }
 0x139   :  { %v1160_v27 = vmul.f32 -0.001358992, %v1159_v21  ;;  %v1167_v20 = vmul.f32 -0.00019511016, %v1159_v21 }
 0x13b   :  { %v1161_v57 = vadd.f32 0.041655596, %v1160_v27  ;;  %v1168_v13 = vadd.f32 0.008332121, %v1167_v20 }
 0x13d   :  { %v1162_v0 = vmul.f32 %v1161_v57, %v1159_v21  ;;  %v1169_v62 = vmul.f32 %v1168_v13, %v1159_v21 }
 0x13f   :  { %v1163_v35 = vadd.f32 -0.4999988, %v1162_v0  ;;  %v1170_v14 = vadd.f32 -0.16666654, %v1169_v62 }
 0x141   :  { %v1164_v37 = vmul.f32 %v1163_v35, %v1159_v21  ;;  %v1171_v18 = vmul.f32 %v1170_v14, %v1159_v21 }
 0x143   :  { %v1165_v33 = vadd.f32 1.0, %v1164_v37  ;;  %v1172_v45 = vadd.f32 1.0, %v1171_v18 }
 0x145   :  { %v1173_v15 = vmul.f32 %v1172_v45, %v1157_v43  ;;  %v1182_v24 = vxor.u32 2147483648, %v1165_v33 }
 0x147   :  { %v1179_v6 = vxor.u32 2147483648, %v1173_v15  ;;  %v1183_v19 = vsel %vm1181_vm10, %v1182_v24, %v1173_v15 }
 0x149   :  { %v1180_v5 = vsel %vm1178_vm11, %v1165_v33, %v1179_v6 }
 0x14a   :  { %v1184_v53 = vsel %vm1177_vm12, %v1180_v5, %v1183_v19 }
 0x14b   :  { %v1185_v26 = vsel %vm1174_vm13, nan, %v1184_v53 }
 0x14c   :  { %1235 = vst [vmem:[%s2093_s3 + $0x7] sm:$0x1] %v1185_v26 }
 0x14d   :  { %1192 = vsyncpa [#allocation3], 1 }
 0x14e   :  { %1193 = vsyncpa [#allocation5], 1 }

</bundles_post_ra>
